<compile_context>
chip_gen: v7x
topology: tpu7x:2x2x1
jax: 0.10.0
libtpu: 0.0.40
codegen_flags: <defaults>
</compile_context>

<pallas_src>
import numpy as np
import jax
import jax.numpy as jnp
from jax import lax
from jax.experimental import pallas as pl
from jax.experimental.pallas import tpu as pltpu

_UNROLL_T = 16  # full Python unroll up to this many timesteps


def lstm_fc_kernel(x_ref, wih_ref, whh_ref, b_ref, fcw_ref, fcb_ref,
                   out_ref, xg_ref):
    """One batch-tile (batch in lanes): full LSTM time loop + final Linear.

    x_ref   : (T, D, TB)   feature-major input tile (bf16 or f32)
    wih_ref : (4H, D)      W_ih, rows permuted to (i, f, o, g)
    whh_ref : (4H, H)      W_hh, rows permuted to (i, f, o, g)
    b_ref   : (4H, 1)      b_ih + b_hh (f32, permuted)
    fcw_ref : (H, 1)       fc.weight^T (f32)
    fcb_ref : (1, 1)       fc.bias (f32)
    out_ref : (1, TB)      lane-dense output row
    xg_ref  : (T, 4H, TB)  VMEM scratch: precomputed input projection (f32)
    """
    T, D, TB = x_ref.shape
    H = fcw_ref.shape[0]
    f32 = jnp.float32

    wih = wih_ref[...]                          # (4H, D)
    whh = whh_ref[...]                          # (4H, H)
    b = b_ref[...]                              # (4H, 1) f32
    mxu_dtype = whh.dtype

    # ---- hoisted input projection (bias folded), off the serial chain ----
    if T <= _UNROLL_T:
        for t in range(T):
            xg_ref[t] = (jnp.dot(wih, x_ref[t],
                                 preferred_element_type=f32) + b)
    else:
        @pl.loop(0, T)
        def _(t):
            xg_ref[t] = (jnp.dot(wih, x_ref[t],
                                 preferred_element_type=f32) + b)

    # ---- serial recurrence: only the small (4H,H)@(H,TB) matmul per step ----
    # TODO(synk): for very long T (>~ a few hundred at tile_b=128) chunk time
    # into an "arbitrary" grid axis with h/c carried in VMEM scratch (or store
    # xg in bf16) to stay under v7x's 64 MiB / default 32 MiB scoped VMEM.
    def step(h, c, xg_t):
        gates = xg_t + jnp.dot(whh, h.astype(mxu_dtype),
                               preferred_element_type=f32)     # (4H, TB) f32
        # gate order (i, f, o, g): one contiguous sigmoid block, one tanh block
        ifo = jax.nn.sigmoid(gates[:3 * H, :])                 # (3H, TB)
        g = jnp.tanh(gates[3 * H:, :])                         # (H, TB)
        c = ifo[H:2 * H] * c + ifo[:H] * g                     # f * c + i * g
        h = ifo[2 * H:] * jnp.tanh(c)                          # o * tanh(c)
        return h, c

    h = jnp.zeros((H, TB), f32)
    c = jnp.zeros((H, TB), f32)

    if T <= _UNROLL_T:
        for t in range(T):
            h, c = step(h, c, xg_ref[t])
    else:
        def body(t, carry):
            hh, cc = carry
            return step(hh, cc, xg_ref[t])
        h, c = lax.fori_loop(0, T, body, (h, c), unroll=4)

    # ---- final FC: VPU multiply + sublane reduce -> lane-dense (1, TB) ----
    out_ref[...] = (jnp.sum(h * fcw_ref[...], axis=0, keepdims=True)
                    + fcb_ref[...])


def init_params(key, input_size, hidden_size):
    """Raw PyTorch-style params: uniform(-1/sqrt(H), 1/sqrt(H)), gate order (i,f,g,o)."""
    ks = jax.random.split(key, 6)
    k = 1.0 / np.sqrt(hidden_size)
    return {
        "w_ih": jax.random.uniform(ks[0], (4 * hidden_size, input_size), jnp.float32, -k, k),
        "w_hh": jax.random.uniform(ks[1], (4 * hidden_size, hidden_size), jnp.float32, -k, k),
        "b_ih": jax.random.uniform(ks[2], (4 * hidden_size,), jnp.float32, -k, k),
        "b_hh": jax.random.uniform(ks[3], (4 * hidden_size,), jnp.float32, -k, k),
        "fc_w": jax.random.uniform(ks[4], (1, hidden_size), jnp.float32, -k, k),
        "fc_b": jax.random.uniform(ks[5], (1,), jnp.float32, -k, k),
    }


def pack_params(raw, mxu_dtype=jnp.bfloat16):
    """Kernel layout: gate rows permuted (i,f,g,o) -> (i,f,o,g); MXU operands in bf16."""
    H = raw["w_hh"].shape[1]
    perm = np.concatenate([np.arange(0, H),            # i
                           np.arange(H, 2 * H),        # f
                           np.arange(3 * H, 4 * H),    # o
                           np.arange(2 * H, 3 * H)])   # g
    return {
        "wih": raw["w_ih"][perm].astype(mxu_dtype),                    # (4H, D)
        "whh": raw["w_hh"][perm].astype(mxu_dtype),                    # (4H, H)
        "b": (raw["b_ih"] + raw["b_hh"])[perm][:, None],               # (4H, 1) f32
        "fcw": jnp.transpose(raw["fc_w"]).astype(jnp.float32),         # (H, 1)
        "fcb": raw["fc_b"][None, :].astype(jnp.float32),               # (1, 1)
    }


def price_change_predictor_lstm(x, params, *, tile_b=None):
    """x: (B, T, input_size) float32 (PyTorch batch_first) -> (B, 1)."""
    B, T, D = x.shape
    H = params["fcw"].shape[0]
    mxu_dtype = params["wih"].dtype

    # batch tile maps to lanes -> multiple of 128; 256 only for very large B
    # so that a 2-TC v7x still gets >= 2 grid steps to shard across cores.
    if tile_b is None:
        tile_b = 256 if B >= 512 else 128
    n_blocks = pl.cdiv(B, tile_b)
    Bp = n_blocks * tile_b

    # feature-major, batch-in-lanes host layout: (T, D, B)
    x_fm = jnp.transpose(x, (1, 2, 0)).astype(mxu_dtype)
    if Bp != B:
        x_fm = jnp.pad(x_fm, ((0, 0), (0, 0), (0, Bp - B)))

    out = pl.pallas_call(
        lstm_fc_kernel,
        out_shape=jax.ShapeDtypeStruct((1, Bp), jnp.float32),
        grid_spec=pltpu.PrefetchScalarGridSpec(
            num_scalar_prefetch=0,
            grid=(n_blocks,),
            in_specs=[
                # x: streamed per batch tile (lane-dense minor dim = TB)
                pl.BlockSpec((T, D, tile_b), lambda i: (0, 0, i)),
                # weights / bias: same block index every step -> stay resident
                pl.BlockSpec((4 * H, D), lambda i: (0, 0)),
                pl.BlockSpec((4 * H, H), lambda i: (0, 0)),
                pl.BlockSpec((4 * H, 1), lambda i: (0, 0)),
                pl.BlockSpec((H, 1), lambda i: (0, 0)),
                pl.BlockSpec((1, 1), lambda i: (0, 0)),
            ],
            # lane-dense output row -> unmasked stores
            out_specs=pl.BlockSpec((1, tile_b), lambda i: (0, i)),
            scratch_shapes=[pltpu.VMEM((T, 4 * H, tile_b), jnp.float32)],
        ),
        compiler_params=pltpu.CompilerParams(
            dimension_semantics=("parallel",)),
    )(x_fm, params["wih"], params["whh"], params["b"],
      params["fcw"], params["fcb"])

    return out[0, :B][:, None]                                  # (B, 1)


def reference_forward(x, raw):
    """Pure-JAX reference matching nn.LSTM(batch_first) + fc(out[:, -1, :])."""
    B, T, D = x.shape
    H = raw["w_hh"].shape[1]
    wih_t = jnp.transpose(raw["w_ih"])          # (D, 4H)
    whh_t = jnp.transpose(raw["w_hh"])          # (H, 4H)
    b = (raw["b_ih"] + raw["b_hh"])[None, :]

    def step(carry, x_t):
        h, c = carry
        gates = x_t @ wih_t + h @ whh_t + b
        i = jax.nn.sigmoid(gates[:, 0 * H:1 * H])
        f = jax.nn.sigmoid(gates[:, 1 * H:2 * H])
        g = jnp.tanh(gates[:, 2 * H:3 * H])
        o = jax.nn.sigmoid(gates[:, 3 * H:4 * H])
        c = f * c + i * g
        h = o * jnp.tanh(c)
        return (h, c), None

    init = (jnp.zeros((B, H), jnp.float32), jnp.zeros((B, H), jnp.float32))
    (h_last, _), _ = lax.scan(step, init, jnp.transpose(x, (1, 0, 2)))
    return h_last @ jnp.transpose(raw["fc_w"]) + raw["fc_b"]


if __name__ == "__main__":
    B, T, INPUT_SIZE, HIDDEN_SIZE = 2, 8, 16, 32

    key = jax.random.PRNGKey(0)
    kx, kp = jax.random.split(key)
    x = jax.random.normal(kx, (B, T, INPUT_SIZE), dtype=jnp.float32)
    raw = init_params(kp, INPUT_SIZE, HIDDEN_SIZE)
    ref = reference_forward(x, raw)

    # exact f32 path: tight tolerance
    params_f32 = pack_params(raw, mxu_dtype=jnp.float32)
    out_f32 = jax.block_until_ready(price_change_predictor_lstm(x, params_f32))
    np.testing.assert_allclose(np.asarray(out_f32), np.asarray(ref),
                               rtol=1e-4, atol=1e-4)

    # bf16-MXU-operand path (default / fast on v6e+v7x): looser tolerance
    params_bf16 = pack_params(raw, mxu_dtype=jnp.bfloat16)
    out_bf16 = jax.block_until_ready(price_change_predictor_lstm(x, params_bf16))
    np.testing.assert_allclose(np.asarray(out_bf16), np.asarray(ref),
                               rtol=5e-2, atol=3e-2)

    assert out_bf16.shape == (B, 1)
    print("KERNEL_OK")
</pallas_src>

<mosaic_0001>
module attributes {stable_mosaic.version = 11 : i64} {
  func.func @lstm_fc_kernel(%arg0: i32, %arg1: memref<8x16x128xf32, #tpu.memory_space<vmem>>, %arg2: memref<128x16xf32, #tpu.memory_space<vmem>>, %arg3: memref<128x32xf32, #tpu.memory_space<vmem>>, %arg4: memref<128x1xf32, #tpu.memory_space<vmem>>, %arg5: memref<32x1xf32, #tpu.memory_space<vmem>>, %arg6: memref<1x1xf32, #tpu.memory_space<vmem>>, %arg7: memref<1x128xf32, #tpu.memory_space<vmem>>, %arg8: memref<8x128x128xf32, #tpu.memory_space<vmem>>) attributes {dimension_semantics = [#tpu.dimension_semantics<parallel>], iteration_bounds = array<i64: 1>, scalar_prefetch = 0 : i64, scratch_operands = 1 : i64, tpu.core_type = #tpu.core_type<tc>, window_params = [{transform_indices = @transform_0, window_bounds = array<i64: 8, 16, 128>}, {pipeline_mode = #tpu.pipeline_mode<synchronous>, transform_indices = @transform_1, window_bounds = array<i64: 128, 16>}, {pipeline_mode = #tpu.pipeline_mode<synchronous>, transform_indices = @transform_2, window_bounds = array<i64: 128, 32>}, {pipeline_mode = #tpu.pipeline_mode<synchronous>, transform_indices = @transform_3, window_bounds = array<i64: 128, 1>}, {pipeline_mode = #tpu.pipeline_mode<synchronous>, transform_indices = @transform_4, window_bounds = array<i64: 32, 1>}, {pipeline_mode = #tpu.pipeline_mode<synchronous>, transform_indices = @transform_5, window_bounds = array<i64: 1, 1>}, {transform_indices = @transform_6, window_bounds = array<i64: 1, 128>}]} {
    %c0 = arith.constant 0 : index
    %c0_0 = arith.constant 0 : index
    %0 = vector.load %arg2[%c0, %c0_0] : memref<128x16xf32, #tpu.memory_space<vmem>>, vector<128x16xf32>
    %c0_1 = arith.constant 0 : index
    %c0_2 = arith.constant 0 : index
    %1 = vector.load %arg3[%c0_1, %c0_2] : memref<128x32xf32, #tpu.memory_space<vmem>>, vector<128x32xf32>
    %c0_3 = arith.constant 0 : index
    %c0_4 = arith.constant 0 : index
    %2 = vector.load %arg4[%c0_3, %c0_4] : memref<128x1xf32, #tpu.memory_space<vmem>>, vector<128x1xf32>
    %c0_5 = arith.constant 0 : index
    %c0_6 = arith.constant 0 : index
    %c0_7 = arith.constant 0 : index
    %3 = vector.load %arg1[%c0_5, %c0_6, %c0_7] : memref<8x16x128xf32, #tpu.memory_space<vmem>>, vector<1x16x128xf32>
    %4 = vector.shape_cast %3 : vector<1x16x128xf32> to vector<16x128xf32>
    %cst = arith.constant dense<0.000000e+00> : vector<128x128xf32>
    %5 = tpu.matmul %0, %4, %cst {dimension_numbers = #tpu.dot_dimension_numbers<[1], [0], [0], [1], [0, 0, 1, 1], [], []>} : vector<128x16xf32>, vector<16x128xf32>, vector<128x128xf32> -> vector<128x128xf32>
    %6 = vector.broadcast %2 : vector<128x1xf32> to vector<128x128xf32>
    %7 = arith.addf %5, %6 : vector<128x128xf32>
    %c0_8 = arith.constant 0 : index
    %c0_9 = arith.constant 0 : index
    %c0_10 = arith.constant 0 : index
    %8 = vector.load %arg8[%c0_8, %c0_9, %c0_10] : memref<8x128x128xf32, #tpu.memory_space<vmem>>, vector<1x128x128xf32>
    %9 = vector.shape_cast %8 : vector<1x128x128xf32> to vector<128x128xf32>
    %10 = vector.shape_cast %7 : vector<128x128xf32> to vector<1x128x128xf32>
    tpu.vector_store %arg8[%c0_8, %c0_9, %c0_10], %10 {strides = array<i32>} : memref<8x128x128xf32, #tpu.memory_space<vmem>>, vector<1x128x128xf32>,
    %c1 = arith.constant 1 : index
    %c0_11 = arith.constant 0 : index
    %c0_12 = arith.constant 0 : index
    %11 = vector.load %arg1[%c1, %c0_11, %c0_12] : memref<8x16x128xf32, #tpu.memory_space<vmem>>, vector<1x16x128xf32>
    %12 = vector.shape_cast %11 : vector<1x16x128xf32> to vector<16x128xf32>
    %cst_13 = arith.constant dense<0.000000e+00> : vector<128x128xf32>
    %13 = tpu.matmul %0, %12, %cst_13 {dimension_numbers = #tpu.dot_dimension_numbers<[1], [0], [0], [1], [0, 0, 1, 1], [], []>} : vector<128x16xf32>, vector<16x128xf32>, vector<128x128xf32> -> vector<128x128xf32>
    %14 = vector.broadcast %2 : vector<128x1xf32> to vector<128x128xf32>
    %15 = arith.addf %13, %14 : vector<128x128xf32>
    %c1_14 = arith.constant 1 : index
    %c0_15 = arith.constant 0 : index
    %c0_16 = arith.constant 0 : index
    %16 = vector.load %arg8[%c1_14, %c0_15, %c0_16] : memref<8x128x128xf32, #tpu.memory_space<vmem>>, vector<1x128x128xf32>
    %17 = vector.shape_cast %16 : vector<1x128x128xf32> to vector<128x128xf32>
    %18 = vector.shape_cast %15 : vector<128x128xf32> to vector<1x128x128xf32>
    tpu.vector_store %arg8[%c1_14, %c0_15, %c0_16], %18 {strides = array<i32>} : memref<8x128x128xf32, #tpu.memory_space<vmem>>, vector<1x128x128xf32>,
    %c2 = arith.constant 2 : index
    %c0_17 = arith.constant 0 : index
    %c0_18 = arith.constant 0 : index
    %19 = vector.load %arg1[%c2, %c0_17, %c0_18] : memref<8x16x128xf32, #tpu.memory_space<vmem>>, vector<1x16x128xf32>
    %20 = vector.shape_cast %19 : vector<1x16x128xf32> to vector<16x128xf32>
    %cst_19 = arith.constant dense<0.000000e+00> : vector<128x128xf32>
    %21 = tpu.matmul %0, %20, %cst_19 {dimension_numbers = #tpu.dot_dimension_numbers<[1], [0], [0], [1], [0, 0, 1, 1], [], []>} : vector<128x16xf32>, vector<16x128xf32>, vector<128x128xf32> -> vector<128x128xf32>
    %22 = vector.broadcast %2 : vector<128x1xf32> to vector<128x128xf32>
    %23 = arith.addf %21, %22 : vector<128x128xf32>
    %c2_20 = arith.constant 2 : index
    %c0_21 = arith.constant 0 : index
    %c0_22 = arith.constant 0 : index
    %24 = vector.load %arg8[%c2_20, %c0_21, %c0_22] : memref<8x128x128xf32, #tpu.memory_space<vmem>>, vector<1x128x128xf32>
    %25 = vector.shape_cast %24 : vector<1x128x128xf32> to vector<128x128xf32>
    %26 = vector.shape_cast %23 : vector<128x128xf32> to vector<1x128x128xf32>
    tpu.vector_store %arg8[%c2_20, %c0_21, %c0_22], %26 {strides = array<i32>} : memref<8x128x128xf32, #tpu.memory_space<vmem>>, vector<1x128x128xf32>,
    %c3 = arith.constant 3 : index
    %c0_23 = arith.constant 0 : index
    %c0_24 = arith.constant 0 : index
    %27 = vector.load %arg1[%c3, %c0_23, %c0_24] : memref<8x16x128xf32, #tpu.memory_space<vmem>>, vector<1x16x128xf32>
    %28 = vector.shape_cast %27 : vector<1x16x128xf32> to vector<16x128xf32>
    %cst_25 = arith.constant dense<0.000000e+00> : vector<128x128xf32>
    %29 = tpu.matmul %0, %28, %cst_25 {dimension_numbers = #tpu.dot_dimension_numbers<[1], [0], [0], [1], [0, 0, 1, 1], [], []>} : vector<128x16xf32>, vector<16x128xf32>, vector<128x128xf32> -> vector<128x128xf32>
    %30 = vector.broadcast %2 : vector<128x1xf32> to vector<128x128xf32>
    %31 = arith.addf %29, %30 : vector<128x128xf32>
    %c3_26 = arith.constant 3 : index
    %c0_27 = arith.constant 0 : index
    %c0_28 = arith.constant 0 : index
    %32 = vector.load %arg8[%c3_26, %c0_27, %c0_28] : memref<8x128x128xf32, #tpu.memory_space<vmem>>, vector<1x128x128xf32>
    %33 = vector.shape_cast %32 : vector<1x128x128xf32> to vector<128x128xf32>
    %34 = vector.shape_cast %31 : vector<128x128xf32> to vector<1x128x128xf32>
    tpu.vector_store %arg8[%c3_26, %c0_27, %c0_28], %34 {strides = array<i32>} : memref<8x128x128xf32, #tpu.memory_space<vmem>>, vector<1x128x128xf32>,
    %c4 = arith.constant 4 : index
    %c0_29 = arith.constant 0 : index
    %c0_30 = arith.constant 0 : index
    %35 = vector.load %arg1[%c4, %c0_29, %c0_30] : memref<8x16x128xf32, #tpu.memory_space<vmem>>, vector<1x16x128xf32>
    %36 = vector.shape_cast %35 : vector<1x16x128xf32> to vector<16x128xf32>
    %cst_31 = arith.constant dense<0.000000e+00> : vector<128x128xf32>
    %37 = tpu.matmul %0, %36, %cst_31 {dimension_numbers = #tpu.dot_dimension_numbers<[1], [0], [0], [1], [0, 0, 1, 1], [], []>} : vector<128x16xf32>, vector<16x128xf32>, vector<128x128xf32> -> vector<128x128xf32>
    %38 = vector.broadcast %2 : vector<128x1xf32> to vector<128x128xf32>
    %39 = arith.addf %37, %38 : vector<128x128xf32>
    %c4_32 = arith.constant 4 : index
    %c0_33 = arith.constant 0 : index
    %c0_34 = arith.constant 0 : index
    %40 = vector.load %arg8[%c4_32, %c0_33, %c0_34] : memref<8x128x128xf32, #tpu.memory_space<vmem>>, vector<1x128x128xf32>
    %41 = vector.shape_cast %40 : vector<1x128x128xf32> to vector<128x128xf32>
    %42 = vector.shape_cast %39 : vector<128x128xf32> to vector<1x128x128xf32>
    tpu.vector_store %arg8[%c4_32, %c0_33, %c0_34], %42 {strides = array<i32>} : memref<8x128x128xf32, #tpu.memory_space<vmem>>, vector<1x128x128xf32>,
    %c5 = arith.constant 5 : index
    %c0_35 = arith.constant 0 : index
    %c0_36 = arith.constant 0 : index
    %43 = vector.load %arg1[%c5, %c0_35, %c0_36] : memref<8x16x128xf32, #tpu.memory_space<vmem>>, vector<1x16x128xf32>
    %44 = vector.shape_cast %43 : vector<1x16x128xf32> to vector<16x128xf32>
    %cst_37 = arith.constant dense<0.000000e+00> : vector<128x128xf32>
    %45 = tpu.matmul %0, %44, %cst_37 {dimension_numbers = #tpu.dot_dimension_numbers<[1], [0], [0], [1], [0, 0, 1, 1], [], []>} : vector<128x16xf32>, vector<16x128xf32>, vector<128x128xf32> -> vector<128x128xf32>
    %46 = vector.broadcast %2 : vector<128x1xf32> to vector<128x128xf32>
    %47 = arith.addf %45, %46 : vector<128x128xf32>
    %c5_38 = arith.constant 5 : index
    %c0_39 = arith.constant 0 : index
    %c0_40 = arith.constant 0 : index
    %48 = vector.load %arg8[%c5_38, %c0_39, %c0_40] : memref<8x128x128xf32, #tpu.memory_space<vmem>>, vector<1x128x128xf32>
    %49 = vector.shape_cast %48 : vector<1x128x128xf32> to vector<128x128xf32>
    %50 = vector.shape_cast %47 : vector<128x128xf32> to vector<1x128x128xf32>
    tpu.vector_store %arg8[%c5_38, %c0_39, %c0_40], %50 {strides = array<i32>} : memref<8x128x128xf32, #tpu.memory_space<vmem>>, vector<1x128x128xf32>,
    %c6 = arith.constant 6 : index
    %c0_41 = arith.constant 0 : index
    %c0_42 = arith.constant 0 : index
    %51 = vector.load %arg1[%c6, %c0_41, %c0_42] : memref<8x16x128xf32, #tpu.memory_space<vmem>>, vector<1x16x128xf32>
    %52 = vector.shape_cast %51 : vector<1x16x128xf32> to vector<16x128xf32>
    %cst_43 = arith.constant dense<0.000000e+00> : vector<128x128xf32>
    %53 = tpu.matmul %0, %52, %cst_43 {dimension_numbers = #tpu.dot_dimension_numbers<[1], [0], [0], [1], [0, 0, 1, 1], [], []>} : vector<128x16xf32>, vector<16x128xf32>, vector<128x128xf32> -> vector<128x128xf32>
    %54 = vector.broadcast %2 : vector<128x1xf32> to vector<128x128xf32>
    %55 = arith.addf %53, %54 : vector<128x128xf32>
    %c6_44 = arith.constant 6 : index
    %c0_45 = arith.constant 0 : index
    %c0_46 = arith.constant 0 : index
    %56 = vector.load %arg8[%c6_44, %c0_45, %c0_46] : memref<8x128x128xf32, #tpu.memory_space<vmem>>, vector<1x128x128xf32>
    %57 = vector.shape_cast %56 : vector<1x128x128xf32> to vector<128x128xf32>
    %58 = vector.shape_cast %55 : vector<128x128xf32> to vector<1x128x128xf32>
    tpu.vector_store %arg8[%c6_44, %c0_45, %c0_46], %58 {strides = array<i32>} : memref<8x128x128xf32, #tpu.memory_space<vmem>>, vector<1x128x128xf32>,
    %c7 = arith.constant 7 : index
    %c0_47 = arith.constant 0 : index
    %c0_48 = arith.constant 0 : index
    %59 = vector.load %arg1[%c7, %c0_47, %c0_48] : memref<8x16x128xf32, #tpu.memory_space<vmem>>, vector<1x16x128xf32>
    %60 = vector.shape_cast %59 : vector<1x16x128xf32> to vector<16x128xf32>
    %cst_49 = arith.constant dense<0.000000e+00> : vector<128x128xf32>
    %61 = tpu.matmul %0, %60, %cst_49 {dimension_numbers = #tpu.dot_dimension_numbers<[1], [0], [0], [1], [0, 0, 1, 1], [], []>} : vector<128x16xf32>, vector<16x128xf32>, vector<128x128xf32> -> vector<128x128xf32>
    %62 = vector.broadcast %2 : vector<128x1xf32> to vector<128x128xf32>
    %63 = arith.addf %61, %62 : vector<128x128xf32>
    %c7_50 = arith.constant 7 : index
    %c0_51 = arith.constant 0 : index
    %c0_52 = arith.constant 0 : index
    %64 = vector.load %arg8[%c7_50, %c0_51, %c0_52] : memref<8x128x128xf32, #tpu.memory_space<vmem>>, vector<1x128x128xf32>
    %65 = vector.shape_cast %64 : vector<1x128x128xf32> to vector<128x128xf32>
    %66 = vector.shape_cast %63 : vector<128x128xf32> to vector<1x128x128xf32>
    tpu.vector_store %arg8[%c7_50, %c0_51, %c0_52], %66 {strides = array<i32>} : memref<8x128x128xf32, #tpu.memory_space<vmem>>, vector<1x128x128xf32>,
    %cst_53 = arith.constant 0.000000e+00 : f32
    %67 = vector.broadcast %cst_53 : f32 to vector<32x128xf32>
    %cst_54 = arith.constant 0.000000e+00 : f32
    %68 = vector.broadcast %cst_54 : f32 to vector<32x128xf32>
    %c0_55 = arith.constant 0 : index
    %c0_56 = arith.constant 0 : index
    %c0_57 = arith.constant 0 : index
    %69 = vector.load %arg8[%c0_55, %c0_56, %c0_57] : memref<8x128x128xf32, #tpu.memory_space<vmem>>, vector<1x128x128xf32>
    %70 = vector.shape_cast %69 : vector<1x128x128xf32> to vector<128x128xf32>
    %cst_58 = arith.constant dense<0.000000e+00> : vector<128x128xf32>
    %71 = tpu.matmul %1, %67, %cst_58 {dimension_numbers = #tpu.dot_dimension_numbers<[1], [0], [0], [1], [0, 0, 1, 1], [], []>} : vector<128x32xf32>, vector<32x128xf32>, vector<128x128xf32> -> vector<128x128xf32>
    %72 = arith.addf %70, %71 : vector<128x128xf32>
    %73 = vector.extract_strided_slice %72 {offsets = [0, 0], sizes = [96, 128], strides = [1, 1]} : vector<128x128xf32> to vector<96x128xf32>
    %74 = arith.negf %73 : vector<96x128xf32>
    %75 = math.exp %74 : vector<96x128xf32>
    %cst_59 = arith.constant 1.000000e+00 : f32
    %76 = vector.broadcast %cst_59 : f32 to vector<96x128xf32>
    %77 = arith.addf %76, %75 : vector<96x128xf32>
    %78 = arith.divf %76, %77 : vector<96x128xf32>
    %79 = vector.extract_strided_slice %72 {offsets = [96, 0], sizes = [32, 128], strides = [1, 1]} : vector<128x128xf32> to vector<32x128xf32>
    %80 = math.tanh %79 : vector<32x128xf32>
    %81 = vector.extract_strided_slice %78 {offsets = [32, 0], sizes = [32, 128], strides = [1, 1]} : vector<96x128xf32> to vector<32x128xf32>
    %82 = arith.mulf %81, %68 : vector<32x128xf32>
    %83 = vector.extract_strided_slice %78 {offsets = [0, 0], sizes = [32, 128], strides = [1, 1]} : vector<96x128xf32> to vector<32x128xf32>
    %84 = arith.mulf %83, %80 : vector<32x128xf32>
    %85 = arith.addf %82, %84 : vector<32x128xf32>
    %86 = vector.extract_strided_slice %78 {offsets = [64, 0], sizes = [32, 128], strides = [1, 1]} : vector<96x128xf32> to vector<32x128xf32>
    %87 = math.tanh %85 : vector<32x128xf32>
    %88 = arith.mulf %86, %87 : vector<32x128xf32>
    %c1_60 = arith.constant 1 : index
    %c0_61 = arith.constant 0 : index
    %c0_62 = arith.constant 0 : index
    %89 = vector.load %arg8[%c1_60, %c0_61, %c0_62] : memref<8x128x128xf32, #tpu.memory_space<vmem>>, vector<1x128x128xf32>
    %90 = vector.shape_cast %89 : vector<1x128x128xf32> to vector<128x128xf32>
    %cst_63 = arith.constant dense<0.000000e+00> : vector<128x128xf32>
    %91 = tpu.matmul %1, %88, %cst_63 {dimension_numbers = #tpu.dot_dimension_numbers<[1], [0], [0], [1], [0, 0, 1, 1], [], []>} : vector<128x32xf32>, vector<32x128xf32>, vector<128x128xf32> -> vector<128x128xf32>
    %92 = arith.addf %90, %91 : vector<128x128xf32>
    %93 = vector.extract_strided_slice %92 {offsets = [0, 0], sizes = [96, 128], strides = [1, 1]} : vector<128x128xf32> to vector<96x128xf32>
    %94 = arith.negf %93 : vector<96x128xf32>
    %95 = math.exp %94 : vector<96x128xf32>
    %cst_64 = arith.constant 1.000000e+00 : f32
    %96 = vector.broadcast %cst_64 : f32 to vector<96x128xf32>
    %97 = arith.addf %96, %95 : vector<96x128xf32>
    %98 = arith.divf %96, %97 : vector<96x128xf32>
    %99 = vector.extract_strided_slice %92 {offsets = [96, 0], sizes = [32, 128], strides = [1, 1]} : vector<128x128xf32> to vector<32x128xf32>
    %100 = math.tanh %99 : vector<32x128xf32>
    %101 = vector.extract_strided_slice %98 {offsets = [32, 0], sizes = [32, 128], strides = [1, 1]} : vector<96x128xf32> to vector<32x128xf32>
    %102 = arith.mulf %101, %85 : vector<32x128xf32>
    %103 = vector.extract_strided_slice %98 {offsets = [0, 0], sizes = [32, 128], strides = [1, 1]} : vector<96x128xf32> to vector<32x128xf32>
    %104 = arith.mulf %103, %100 : vector<32x128xf32>
    %105 = arith.addf %102, %104 : vector<32x128xf32>
    %106 = vector.extract_strided_slice %98 {offsets = [64, 0], sizes = [32, 128], strides = [1, 1]} : vector<96x128xf32> to vector<32x128xf32>
    %107 = math.tanh %105 : vector<32x128xf32>
    %108 = arith.mulf %106, %107 : vector<32x128xf32>
    %c2_65 = arith.constant 2 : index
    %c0_66 = arith.constant 0 : index
    %c0_67 = arith.constant 0 : index
    %109 = vector.load %arg8[%c2_65, %c0_66, %c0_67] : memref<8x128x128xf32, #tpu.memory_space<vmem>>, vector<1x128x128xf32>
    %110 = vector.shape_cast %109 : vector<1x128x128xf32> to vector<128x128xf32>
    %cst_68 = arith.constant dense<0.000000e+00> : vector<128x128xf32>
    %111 = tpu.matmul %1, %108, %cst_68 {dimension_numbers = #tpu.dot_dimension_numbers<[1], [0], [0], [1], [0, 0, 1, 1], [], []>} : vector<128x32xf32>, vector<32x128xf32>, vector<128x128xf32> -> vector<128x128xf32>
    %112 = arith.addf %110, %111 : vector<128x128xf32>
    %113 = vector.extract_strided_slice %112 {offsets = [0, 0], sizes = [96, 128], strides = [1, 1]} : vector<128x128xf32> to vector<96x128xf32>
    %114 = arith.negf %113 : vector<96x128xf32>
    %115 = math.exp %114 : vector<96x128xf32>
    %cst_69 = arith.constant 1.000000e+00 : f32
    %116 = vector.broadcast %cst_69 : f32 to vector<96x128xf32>
    %117 = arith.addf %116, %115 : vector<96x128xf32>
    %118 = arith.divf %116, %117 : vector<96x128xf32>
    %119 = vector.extract_strided_slice %112 {offsets = [96, 0], sizes = [32, 128], strides = [1, 1]} : vector<128x128xf32> to vector<32x128xf32>
    %120 = math.tanh %119 : vector<32x128xf32>
    %121 = vector.extract_strided_slice %118 {offsets = [32, 0], sizes = [32, 128], strides = [1, 1]} : vector<96x128xf32> to vector<32x128xf32>
    %122 = arith.mulf %121, %105 : vector<32x128xf32>
    %123 = vector.extract_strided_slice %118 {offsets = [0, 0], sizes = [32, 128], strides = [1, 1]} : vector<96x128xf32> to vector<32x128xf32>
    %124 = arith.mulf %123, %120 : vector<32x128xf32>
    %125 = arith.addf %122, %124 : vector<32x128xf32>
    %126 = vector.extract_strided_slice %118 {offsets = [64, 0], sizes = [32, 128], strides = [1, 1]} : vector<96x128xf32> to vector<32x128xf32>
    %127 = math.tanh %125 : vector<32x128xf32>
    %128 = arith.mulf %126, %127 : vector<32x128xf32>
    %c3_70 = arith.constant 3 : index
    %c0_71 = arith.constant 0 : index
    %c0_72 = arith.constant 0 : index
    %129 = vector.load %arg8[%c3_70, %c0_71, %c0_72] : memref<8x128x128xf32, #tpu.memory_space<vmem>>, vector<1x128x128xf32>
    %130 = vector.shape_cast %129 : vector<1x128x128xf32> to vector<128x128xf32>
    %cst_73 = arith.constant dense<0.000000e+00> : vector<128x128xf32>
    %131 = tpu.matmul %1, %128, %cst_73 {dimension_numbers = #tpu.dot_dimension_numbers<[1], [0], [0], [1], [0, 0, 1, 1], [], []>} : vector<128x32xf32>, vector<32x128xf32>, vector<128x128xf32> -> vector<128x128xf32>
    %132 = arith.addf %130, %131 : vector<128x128xf32>
    %133 = vector.extract_strided_slice %132 {offsets = [0, 0], sizes = [96, 128], strides = [1, 1]} : vector<128x128xf32> to vector<96x128xf32>
    %134 = arith.negf %133 : vector<96x128xf32>
    %135 = math.exp %134 : vector<96x128xf32>
    %cst_74 = arith.constant 1.000000e+00 : f32
    %136 = vector.broadcast %cst_74 : f32 to vector<96x128xf32>
    %137 = arith.addf %136, %135 : vector<96x128xf32>
    %138 = arith.divf %136, %137 : vector<96x128xf32>
    %139 = vector.extract_strided_slice %132 {offsets = [96, 0], sizes = [32, 128], strides = [1, 1]} : vector<128x128xf32> to vector<32x128xf32>
    %140 = math.tanh %139 : vector<32x128xf32>
    %141 = vector.extract_strided_slice %138 {offsets = [32, 0], sizes = [32, 128], strides = [1, 1]} : vector<96x128xf32> to vector<32x128xf32>
    %142 = arith.mulf %141, %125 : vector<32x128xf32>
    %143 = vector.extract_strided_slice %138 {offsets = [0, 0], sizes = [32, 128], strides = [1, 1]} : vector<96x128xf32> to vector<32x128xf32>
    %144 = arith.mulf %143, %140 : vector<32x128xf32>
    %145 = arith.addf %142, %144 : vector<32x128xf32>
    %146 = vector.extract_strided_slice %138 {offsets = [64, 0], sizes = [32, 128], strides = [1, 1]} : vector<96x128xf32> to vector<32x128xf32>
    %147 = math.tanh %145 : vector<32x128xf32>
    %148 = arith.mulf %146, %147 : vector<32x128xf32>
    %c4_75 = arith.constant 4 : index
    %c0_76 = arith.constant 0 : index
    %c0_77 = arith.constant 0 : index
    %149 = vector.load %arg8[%c4_75, %c0_76, %c0_77] : memref<8x128x128xf32, #tpu.memory_space<vmem>>, vector<1x128x128xf32>
    %150 = vector.shape_cast %149 : vector<1x128x128xf32> to vector<128x128xf32>
    %cst_78 = arith.constant dense<0.000000e+00> : vector<128x128xf32>
    %151 = tpu.matmul %1, %148, %cst_78 {dimension_numbers = #tpu.dot_dimension_numbers<[1], [0], [0], [1], [0, 0, 1, 1], [], []>} : vector<128x32xf32>, vector<32x128xf32>, vector<128x128xf32> -> vector<128x128xf32>
    %152 = arith.addf %150, %151 : vector<128x128xf32>
    %153 = vector.extract_strided_slice %152 {offsets = [0, 0], sizes = [96, 128], strides = [1, 1]} : vector<128x128xf32> to vector<96x128xf32>
    %154 = arith.negf %153 : vector<96x128xf32>
    %155 = math.exp %154 : vector<96x128xf32>
    %cst_79 = arith.constant 1.000000e+00 : f32
    %156 = vector.broadcast %cst_79 : f32 to vector<96x128xf32>
    %157 = arith.addf %156, %155 : vector<96x128xf32>
    %158 = arith.divf %156, %157 : vector<96x128xf32>
    %159 = vector.extract_strided_slice %152 {offsets = [96, 0], sizes = [32, 128], strides = [1, 1]} : vector<128x128xf32> to vector<32x128xf32>
    %160 = math.tanh %159 : vector<32x128xf32>
    %161 = vector.extract_strided_slice %158 {offsets = [32, 0], sizes = [32, 128], strides = [1, 1]} : vector<96x128xf32> to vector<32x128xf32>
    %162 = arith.mulf %161, %145 : vector<32x128xf32>
    %163 = vector.extract_strided_slice %158 {offsets = [0, 0], sizes = [32, 128], strides = [1, 1]} : vector<96x128xf32> to vector<32x128xf32>
    %164 = arith.mulf %163, %160 : vector<32x128xf32>
    %165 = arith.addf %162, %164 : vector<32x128xf32>
    %166 = vector.extract_strided_slice %158 {offsets = [64, 0], sizes = [32, 128], strides = [1, 1]} : vector<96x128xf32> to vector<32x128xf32>
    %167 = math.tanh %165 : vector<32x128xf32>
    %168 = arith.mulf %166, %167 : vector<32x128xf32>
    %c5_80 = arith.constant 5 : index
    %c0_81 = arith.constant 0 : index
    %c0_82 = arith.constant 0 : index
    %169 = vector.load %arg8[%c5_80, %c0_81, %c0_82] : memref<8x128x128xf32, #tpu.memory_space<vmem>>, vector<1x128x128xf32>
    %170 = vector.shape_cast %169 : vector<1x128x128xf32> to vector<128x128xf32>
    %cst_83 = arith.constant dense<0.000000e+00> : vector<128x128xf32>
    %171 = tpu.matmul %1, %168, %cst_83 {dimension_numbers = #tpu.dot_dimension_numbers<[1], [0], [0], [1], [0, 0, 1, 1], [], []>} : vector<128x32xf32>, vector<32x128xf32>, vector<128x128xf32> -> vector<128x128xf32>
    %172 = arith.addf %170, %171 : vector<128x128xf32>
    %173 = vector.extract_strided_slice %172 {offsets = [0, 0], sizes = [96, 128], strides = [1, 1]} : vector<128x128xf32> to vector<96x128xf32>
    %174 = arith.negf %173 : vector<96x128xf32>
    %175 = math.exp %174 : vector<96x128xf32>
    %cst_84 = arith.constant 1.000000e+00 : f32
    %176 = vector.broadcast %cst_84 : f32 to vector<96x128xf32>
    %177 = arith.addf %176, %175 : vector<96x128xf32>
    %178 = arith.divf %176, %177 : vector<96x128xf32>
    %179 = vector.extract_strided_slice %172 {offsets = [96, 0], sizes = [32, 128], strides = [1, 1]} : vector<128x128xf32> to vector<32x128xf32>
    %180 = math.tanh %179 : vector<32x128xf32>
    %181 = vector.extract_strided_slice %178 {offsets = [32, 0], sizes = [32, 128], strides = [1, 1]} : vector<96x128xf32> to vector<32x128xf32>
    %182 = arith.mulf %181, %165 : vector<32x128xf32>
    %183 = vector.extract_strided_slice %178 {offsets = [0, 0], sizes = [32, 128], strides = [1, 1]} : vector<96x128xf32> to vector<32x128xf32>
    %184 = arith.mulf %183, %180 : vector<32x128xf32>
    %185 = arith.addf %182, %184 : vector<32x128xf32>
    %186 = vector.extract_strided_slice %178 {offsets = [64, 0], sizes = [32, 128], strides = [1, 1]} : vector<96x128xf32> to vector<32x128xf32>
    %187 = math.tanh %185 : vector<32x128xf32>
    %188 = arith.mulf %186, %187 : vector<32x128xf32>
    %c6_85 = arith.constant 6 : index
    %c0_86 = arith.constant 0 : index
    %c0_87 = arith.constant 0 : index
    %189 = vector.load %arg8[%c6_85, %c0_86, %c0_87] : memref<8x128x128xf32, #tpu.memory_space<vmem>>, vector<1x128x128xf32>
    %190 = vector.shape_cast %189 : vector<1x128x128xf32> to vector<128x128xf32>
    %cst_88 = arith.constant dense<0.000000e+00> : vector<128x128xf32>
    %191 = tpu.matmul %1, %188, %cst_88 {dimension_numbers = #tpu.dot_dimension_numbers<[1], [0], [0], [1], [0, 0, 1, 1], [], []>} : vector<128x32xf32>, vector<32x128xf32>, vector<128x128xf32> -> vector<128x128xf32>
    %192 = arith.addf %190, %191 : vector<128x128xf32>
    %193 = vector.extract_strided_slice %192 {offsets = [0, 0], sizes = [96, 128], strides = [1, 1]} : vector<128x128xf32> to vector<96x128xf32>
    %194 = arith.negf %193 : vector<96x128xf32>
    %195 = math.exp %194 : vector<96x128xf32>
    %cst_89 = arith.constant 1.000000e+00 : f32
    %196 = vector.broadcast %cst_89 : f32 to vector<96x128xf32>
    %197 = arith.addf %196, %195 : vector<96x128xf32>
    %198 = arith.divf %196, %197 : vector<96x128xf32>
    %199 = vector.extract_strided_slice %192 {offsets = [96, 0], sizes = [32, 128], strides = [1, 1]} : vector<128x128xf32> to vector<32x128xf32>
    %200 = math.tanh %199 : vector<32x128xf32>
    %201 = vector.extract_strided_slice %198 {offsets = [32, 0], sizes = [32, 128], strides = [1, 1]} : vector<96x128xf32> to vector<32x128xf32>
    %202 = arith.mulf %201, %185 : vector<32x128xf32>
    %203 = vector.extract_strided_slice %198 {offsets = [0, 0], sizes = [32, 128], strides = [1, 1]} : vector<96x128xf32> to vector<32x128xf32>
    %204 = arith.mulf %203, %200 : vector<32x128xf32>
    %205 = arith.addf %202, %204 : vector<32x128xf32>
    %206 = vector.extract_strided_slice %198 {offsets = [64, 0], sizes = [32, 128], strides = [1, 1]} : vector<96x128xf32> to vector<32x128xf32>
    %207 = math.tanh %205 : vector<32x128xf32>
    %208 = arith.mulf %206, %207 : vector<32x128xf32>
    %c7_90 = arith.constant 7 : index
    %c0_91 = arith.constant 0 : index
    %c0_92 = arith.constant 0 : index
    %209 = vector.load %arg8[%c7_90, %c0_91, %c0_92] : memref<8x128x128xf32, #tpu.memory_space<vmem>>, vector<1x128x128xf32>
    %210 = vector.shape_cast %209 : vector<1x128x128xf32> to vector<128x128xf32>
    %cst_93 = arith.constant dense<0.000000e+00> : vector<128x128xf32>
    %211 = tpu.matmul %1, %208, %cst_93 {dimension_numbers = #tpu.dot_dimension_numbers<[1], [0], [0], [1], [0, 0, 1, 1], [], []>} : vector<128x32xf32>, vector<32x128xf32>, vector<128x128xf32> -> vector<128x128xf32>
    %212 = arith.addf %210, %211 : vector<128x128xf32>
    %213 = vector.extract_strided_slice %212 {offsets = [0, 0], sizes = [96, 128], strides = [1, 1]} : vector<128x128xf32> to vector<96x128xf32>
    %214 = arith.negf %213 : vector<96x128xf32>
    %215 = math.exp %214 : vector<96x128xf32>
    %cst_94 = arith.constant 1.000000e+00 : f32
    %216 = vector.broadcast %cst_94 : f32 to vector<96x128xf32>
    %217 = arith.addf %216, %215 : vector<96x128xf32>
    %218 = arith.divf %216, %217 : vector<96x128xf32>
    %219 = vector.extract_strided_slice %212 {offsets = [96, 0], sizes = [32, 128], strides = [1, 1]} : vector<128x128xf32> to vector<32x128xf32>
    %220 = math.tanh %219 : vector<32x128xf32>
    %221 = vector.extract_strided_slice %218 {offsets = [32, 0], sizes = [32, 128], strides = [1, 1]} : vector<96x128xf32> to vector<32x128xf32>
    %222 = arith.mulf %221, %205 : vector<32x128xf32>
    %223 = vector.extract_strided_slice %218 {offsets = [0, 0], sizes = [32, 128], strides = [1, 1]} : vector<96x128xf32> to vector<32x128xf32>
    %224 = arith.mulf %223, %220 : vector<32x128xf32>
    %225 = arith.addf %222, %224 : vector<32x128xf32>
    %226 = vector.extract_strided_slice %218 {offsets = [64, 0], sizes = [32, 128], strides = [1, 1]} : vector<96x128xf32> to vector<32x128xf32>
    %227 = math.tanh %225 : vector<32x128xf32>
    %228 = arith.mulf %226, %227 : vector<32x128xf32>
    %c0_95 = arith.constant 0 : index
    %c0_96 = arith.constant 0 : index
    %229 = vector.load %arg5[%c0_95, %c0_96] : memref<32x1xf32, #tpu.memory_space<vmem>>, vector<32x1xf32>
    %230 = vector.broadcast %229 : vector<32x1xf32> to vector<32x128xf32>
    %231 = arith.mulf %228, %230 : vector<32x128xf32>
    %cst_97 = arith.constant dense<0.000000e+00> : vector<128xf32>
    %232 = vector.multi_reduction <add>, %231, %cst_97 [0] : vector<32x128xf32> to vector<128xf32>
    %233 = vector.shape_cast %232 : vector<128xf32> to vector<1x128xf32>
    %c0_98 = arith.constant 0 : index
    %c0_99 = arith.constant 0 : index
    %234 = vector.load %arg6[%c0_98, %c0_99] : memref<1x1xf32, #tpu.memory_space<vmem>>, vector<1x1xf32>
    %235 = vector.broadcast %234 : vector<1x1xf32> to vector<1x128xf32>
    %236 = arith.addf %233, %235 : vector<1x128xf32>
    %c0_100 = arith.constant 0 : index
    %c0_101 = arith.constant 0 : index
    %237 = vector.load %arg7[%c0_100, %c0_101] : memref<1x128xf32, #tpu.memory_space<vmem>>, vector<1x128xf32>
    tpu.vector_store %arg7[%c0_100, %c0_101], %236 {strides = array<i32>} : memref<1x128xf32, #tpu.memory_space<vmem>>, vector<1x128xf32>,
    return
  }
  func.func @transform_0(%arg0: i32) -> (i32, i32, i32) {
    %c0_i32 = arith.constant 0 : i32
    %c0_i32_0 = arith.constant 0 : i32
    %c0_i32_1 = arith.constant 0 : i32
    return %c0_i32, %c0_i32_0, %arg0 : i32, i32, i32
  }
  func.func @transform_1(%arg0: i32) -> (i32, i32) {
    %c0_i32 = arith.constant 0 : i32
    %c0_i32_0 = arith.constant 0 : i32
    %c0_i32_1 = arith.constant 0 : i32
    return %c0_i32, %c0_i32_0 : i32, i32
  }
  func.func @transform_2(%arg0: i32) -> (i32, i32) {
    %c0_i32 = arith.constant 0 : i32
    %c0_i32_0 = arith.constant 0 : i32
    %c0_i32_1 = arith.constant 0 : i32
    return %c0_i32, %c0_i32_0 : i32, i32
  }
  func.func @transform_3(%arg0: i32) -> (i32, i32) {
    %c0_i32 = arith.constant 0 : i32
    %c0_i32_0 = arith.constant 0 : i32
    %c0_i32_1 = arith.constant 0 : i32
    return %c0_i32, %c0_i32_0 : i32, i32
  }
  func.func @transform_4(%arg0: i32) -> (i32, i32) {
    %c0_i32 = arith.constant 0 : i32
    %c0_i32_0 = arith.constant 0 : i32
    %c0_i32_1 = arith.constant 0 : i32
    return %c0_i32, %c0_i32_0 : i32, i32
  }
  func.func @transform_5(%arg0: i32) -> (i32, i32) {
    %c0_i32 = arith.constant 0 : i32
    %c0_i32_0 = arith.constant 0 : i32
    %c0_i32_1 = arith.constant 0 : i32
    return %c0_i32, %c0_i32_0 : i32, i32
  }
  func.func @transform_6(%arg0: i32) -> (i32, i32) {
    %c0_i32 = arith.constant 0 : i32
    %c0_i32_0 = arith.constant 0 : i32
    return %c0_i32, %arg0 : i32, i32
  }
}

</mosaic_0001>

<bundles_post_ra>
// kernel: tpu_custom_call.1
= control target key start
LH: loop header
LB: loop body
LE: loop exit
PB: predicated region body
PF: predicated region fallthrough
CT: control target
= control target key end

     0   :  { %s7093_s0 = inlined_call_operand.vmem [shape: f32[8,16,128], index: 0, kind: input, shape index: {}]   ;;  %s7094_s1 = inlined_call_operand.vmem [shape: f32[128,16], index: 1, kind: input, shape index: {}]   ;;  %s7095_s2 = inlined_call_operand.vmem [shape: f32[128,32], index: 2, kind: input, shape index: {}]   ;;  %s7096_s3 = inlined_call_operand.vmem [shape: f32[128,1], index: 3, kind: input, shape index: {}]   ;;  %s7097_s4 = inlined_call_operand.vmem [shape: f32[32,1], index: 4, kind: input, shape index: {}]   ;;  %s7098_s5 = inlined_call_operand.<no memory space> [shape: f32[1,1], index: 5, kind: input, shape index: {}]   ;;  %s7099_s6 = inlined_call_operand.hbm [shape: f32[1,128], index: 6, kind: output, shape index: {}]  }
   0x1   :  { %v11_v0 = vstv %s7098_s5 }
   0x2   :  { %12 = vst [vmem:[#allocation3] sm:$0x1] %v11_v0 }
   0x3   :  { %v74_v1 = vld [vmem:[%s7093_s0] sm:$0xff]  ;;  %v75_v2 = vld [vmem:[%s7093_s0 + $0x8] sm:$0xff]  ;;  %vm156_vm0 = vcmask 130048   ;;  %v5938_v6 = vld [vmem:[%s7094_s1 + $0x10] sm:$0xff] }
   0x4   :  { %v5924_v3 = vld [vmem:[%s7094_s1] sm:$0xff]  ;;  %v4958_v4 = vpack.c.bf16 %v75_v2, %v74_v1  ;;  %v5933_v5 = vld [vmem:[%s7094_s1 + $0x8] sm:$0xff]  ;;  %v5959_v12 = vld [vmem:[%s7094_s1 + $0x18] sm:$0xff] }
   0x5   :  { %4488 = vmatprep.mubr.msk.f32.mxu0 %vm156_vm0, %v5924_v3  ;;  %4516 = vmatprep.mubr.msk.f32.mxu1 %vm156_vm0, %v5924_v3  ;;  %v3851_v7 = vld [vmem:[%s7093_s0 + $0x20] sm:$0xff]  ;;  %v3852_v8 = vld [vmem:[%s7093_s0 + $0x28] sm:$0xff] }
   0x6   :  { %4959 = vmatprep.subr.bf16.mxu0 %v4958_v4  ;;  %v4966_v9 = vpack.c.bf16 %v3852_v8, %v3851_v7  ;;  %v3887_v10 = vld [vmem:[%s7093_s0 + $0x40] sm:$0xff]  ;;  %v3888_v11 = vld [vmem:[%s7093_s0 + $0x48] sm:$0xff] }
   0x7   :  { %4961 = vmatpush3.bf16.msra.mxu0 %v4958_v4  ;;  %v4974_v13 = vpack.c.bf16 %v3888_v11, %v3887_v10  ;;  %v5964_v14 = vld [vmem:[%s7094_s1 + $0x20] sm:$0xff] }
   0x8   :  { %4967 = vmatprep.subr.bf16.mxu0 %v4966_v9 }
   0xa   :  { %4489 = vmatmul.mubr.msk.f32.vlgmr.msra.gmra.mrb[0].mxu0 %vm156_vm0, %v5933_v5 }
   0xb   :  { %4491 = vmatprep.mubr.msk.f32.mxu0 %vm156_vm0, %v5938_v6  ;;  %4969 = vmatpush3.bf16.msra.mxu0 %v4966_v9 }
   0xc   :  { %13 = vsyncpa [#allocation5], 0  ;;  %4975 = vmatprep.subr.bf16.mxu0 %v4974_v13  ;;  %v5973_v15 = vld [vmem:[%s7094_s1 + $0x28] sm:$0xff]  ;;  %v5978_v16 = vld [vmem:[%s7094_s1 + $0x30] sm:$0xff]  ;;  %v5874_v30 = vmov 0   ;;  %v5875_v59 = vmov 0.0  }
   0xd   :  { %v5987_v17 = vld [vmem:[%s7094_s1 + $0x38] sm:$0xff]  ;;  %v5992_v18 = vld [vmem:[%s7094_s1 + $0x40] sm:$0xff]  ;;  %v6001_v19 = vld [vmem:[%s7094_s1 + $0x48] sm:$0xff]  ;;  %5305 = vset.pattern.permute.xlu0 %v5874_v30  ;;  %5306 = vset.pattern.permute.xlu1 %v5874_v30  ;;  %vm1537_vm1 = vcmask 261120  }
   0xe   :  { %4492 = vmatmul.mubr.msk.f32.gmra.mrb[2].mxu0 %vm156_vm0, %v5959_v12  ;;  %v6006_v20 = vld [vmem:[%s7094_s1 + $0x50] sm:$0xff]  ;;  %v6015_v21 = vld [vmem:[%s7094_s1 + $0x58] sm:$0xff]  ;;  %v6020_v22 = vld [vmem:[%s7094_s1 + $0x60] sm:$0xff] }
   0xf   :  { %4494 = vmatprep.mubr.msk.f32.mxu0 %vm156_vm0, %v5964_v14  ;;  %v6029_v23 = vld [vmem:[%s7094_s1 + $0x68] sm:$0xff]  ;;  %v6034_v24 = vld [vmem:[%s7094_s1 + $0x70] sm:$0xff]  ;;  %v6043_v25 = vld [vmem:[%s7094_s1 + $0x78] sm:$0xff] }
  0x10   :  { %v3923_v26 = vld [vmem:[%s7093_s0 + $0x60] sm:$0xff]  ;;  %v3924_v27 = vld [vmem:[%s7093_s0 + $0x68] sm:$0xff]  ;;  %v60_v34 = vld [vmem:[%s7096_s3 + $0x10] sm:$0xff] }
  0x11   :  { %v58_v28 = vld [vmem:[%s7096_s3] sm:$0xff]  ;;  %v6061_v31 = vpack.c.bf16 %v3924_v27, %v3923_v26  ;;  %v59_v32 = vld [vmem:[%s7096_s3 + $0x8] sm:$0xff]  ;;  %v3833_v35 = vld [vmem:[%s7093_s0 + $0x10] sm:$0xff] }
  0x12   :  { %4495 = vmatmul.mubr.msk.f32.gmra.mrb[4].mxu0 %vm156_vm0, %v5973_v15  ;;  %v62_v29 = vld [vmem:[%s7096_s3 + $0x20] sm:$0xff]  ;;  %78 = vperm.xlu0 %5305, %v58_v28   ;;  %v63_v33 = vld [vmem:[%s7096_s3 + $0x28] sm:$0xff]  ;;  %v3834_v36 = vld [vmem:[%s7093_s0 + $0x18] sm:$0xff] }
  0x13   :  { %4497 = vmatprep.mubr.msk.f32.mxu0 %vm156_vm0, %v5978_v16  ;;  %98 = vperm.xlu1 %5306, %v62_v29   ;;  %v3869_v37 = vld [vmem:[%s7093_s0 + $0x30] sm:$0xff]  ;;  %v61_v38 = vld [vmem:[%s7096_s3 + $0x18] sm:$0xff]  ;;  %v4962_v39 = vpack.c.bf16 %v3834_v36, %v3833_v35  ;;  %v66_v44 = vld [vmem:[%s7096_s3 + $0x40] sm:$0xff] }
  0x14   :  { %v3870_v40 = vld [vmem:[%s7093_s0 + $0x38] sm:$0xff]  ;;  %v64_v42 = vld [vmem:[%s7096_s3 + $0x30] sm:$0xff]  ;;  %v67_v45 = vld [vmem:[%s7096_s3 + $0x48] sm:$0xff] }
  0x15   :  { %v4970_v41 = vpack.c.bf16 %v3870_v40, %v3869_v37  ;;  %4963 = vmatprep.subr.bf16.mxu1 %v4962_v39  ;;  %v65_v43 = vld [vmem:[%s7096_s3 + $0x38] sm:$0xff]  ;;  %v70_v46 = vld [vmem:[%s7096_s3 + $0x60] sm:$0xff]  ;;  %v71_v47 = vld [vmem:[%s7096_s3 + $0x68] sm:$0xff] }
  0x16   :  { %4498 = vmatmul.mubr.msk.f32.gmra.mrb[6].mxu0 %vm156_vm0, %v5987_v17  ;;  %83 = vperm.xlu0 %5305, %v59_v32   ;;  %v68_v48 = vld [vmem:[%s7096_s3 + $0x50] sm:$0xff]  ;;  %v69_v49 = vld [vmem:[%s7096_s3 + $0x58] sm:$0xff]  ;;  %v3754_v52 = vld [vmem:[%s7097_s4] sm:$0xff] }
  0x17   :  { %4500 = vmatprep.mubr.msk.f32.mxu0 %vm156_vm0, %v5992_v18  ;;  %103 = vperm.xlu1 %5306, %v63_v33   ;;  %v72_v50 = vld [vmem:[%s7096_s3 + $0x70] sm:$0xff]  ;;  %v73_v51 = vld [vmem:[%s7096_s3 + $0x78] sm:$0xff]  ;;  %v3755_v53 = vld [vmem:[%s7097_s4 + $0x8] sm:$0xff] }
  0x18   :  { %4965 = vmatpush3.bf16.msra.mxu1 %v4962_v39  ;;  %v3905_v54 = vld [vmem:[%s7093_s0 + $0x50] sm:$0xff]  ;;  %v3906_v55 = vld [vmem:[%s7093_s0 + $0x58] sm:$0xff]  ;;  %v3791_v60 = vld [vmem:[#allocation3] sm:$0x1] }
  0x19   :  { %4971 = vmatprep.subr.bf16.mxu1 %v4970_v41  ;;  %v4978_v56 = vpack.c.bf16 %v3906_v55, %v3905_v54  ;;  %v3756_v57 = vld [vmem:[%s7097_s4 + $0x10] sm:$0xff]  ;;  %v3757_v58 = vld [vmem:[%s7097_s4 + $0x18] sm:$0xff]  ;;  %v6312_v61 = vld [vmem:[%s7095_s2] sm:$0xff] }
  0x1a   :  { %4501 = vmatmul.mubr.msk.f32.gmra.mrb[8].mxu0 %vm156_vm0, %v6001_v19  ;;  %88 = vperm.xlu0 %5305, %v60_v34   ;;  %v6325_v62 = vld [vmem:[%s7095_s2 + $0x8] sm:$0xff]  ;;  %v6330_v63 = vld [vmem:[%s7095_s2 + $0x10] sm:$0xff]  ;;  %v6343_v0 = vld [vmem:[%s7095_s2 + $0x18] sm:$0xff] }
  0x1b   :  { %4503 = vmatprep.mubr.msk.f32.mxu0 %vm156_vm0, %v6006_v20  ;;  %93 = vperm.xlu1 %5306, %v61_v38   ;;  %v6348_v1 = vld [vmem:[%s7095_s2 + $0x20] sm:$0xff]  ;;  %v6361_v2 = vld [vmem:[%s7095_s2 + $0x28] sm:$0xff]  ;;  %v6366_v4 = vld [vmem:[%s7095_s2 + $0x30] sm:$0xff] }
  0x1c   :  { %4517 = vmatmul.mubr.msk.f32.vlgmr.msra.gmra.mrb[0].mxu1 %vm156_vm0, %v5933_v5  ;;  %v6379_v7 = vld [vmem:[%s7095_s2 + $0x38] sm:$0xff]  ;;  %v6384_v8 = vld [vmem:[%s7095_s2 + $0x40] sm:$0xff]  ;;  %v6398_v9 = vld [vmem:[%s7095_s2 + $0x50] sm:$0xff] }
  0x1d   :  { %4519 = vmatprep.mubr.msk.f32.mxu1 %vm156_vm0, %v5938_v6  ;;  %4973 = vmatpush3.bf16.msra.mxu1 %v4970_v41  ;;  %v6407_v10 = vld [vmem:[%s7095_s2 + $0x58] sm:$0xff]  ;;  %v6412_v11 = vld [vmem:[%s7095_s2 + $0x60] sm:$0xff]  ;;  %v6426_v26 = vld [vmem:[%s7095_s2 + $0x70] sm:$0xff] }
  0x1e   :  { %4504 = vmatmul.mubr.msk.f32.gmra.mrb[10].mxu0 %vm156_vm0, %v6015_v21  ;;  %108 = vperm.xlu0 %5305, %v64_v42   ;;  %v6435_v27 = vld [vmem:[%s7095_s2 + $0x78] sm:$0xff]  ;;  %v3941_v28 = vld [vmem:[%s7093_s0 + $0x70] sm:$0xff] }
  0x1f   :  { %4506 = vmatprep.mubr.msk.f32.mxu0 %vm156_vm0, %v6020_v22  ;;  %113 = vperm.xlu1 %5306, %v65_v43   ;;  %v3942_v29 = vld [vmem:[%s7093_s0 + $0x78] sm:$0xff] }
  0x20   :  { %4520 = vmatmul.mubr.msk.f32.gmra.mrb[2].mxu1 %vm156_vm0, %v5959_v12  ;;  %4979 = vmatprep.subr.bf16.mxu1 %v4978_v56  ;;  %v4986_v30 = vpack.c.bf16 %v3942_v29, %v3941_v28 }
  0x21   :  { %4522 = vmatprep.mubr.msk.f32.mxu1 %vm156_vm0, %v5964_v14 }
  0x22   :  { %4507 = vmatmul.mubr.msk.f32.gmra.mrb[12].mxu0 %vm156_vm0, %v6029_v23  ;;  %118 = vperm.xlu0 %5305, %v66_v44  }
  0x23   :  { %4509 = vmatprep.mubr.msk.f32.mxu0 %vm156_vm0, %v6034_v24  ;;  %123 = vperm.xlu1 %5306, %v67_v45  }
  0x24   :  { %4523 = vmatmul.mubr.msk.f32.gmra.mrb[4].mxu1 %vm156_vm0, %v5973_v15 }
  0x25   :  { %4525 = vmatprep.mubr.msk.f32.mxu1 %vm156_vm0, %v5978_v16 }
  0x26   :  { %4510 = vmatmul.mubr.msk.f32.gmra.mrb[14].mxu0 %vm156_vm0, %v6043_v25  ;;  %138 = vperm.xlu0 %5305, %v70_v46  }
  0x27   :  { %4544 = vmatprep.mubr.msk.f32.mxu0 %vm156_vm0, %v5924_v3  ;;  %143 = vperm.xlu1 %5306, %v71_v47  }
  0x28   :  { %4526 = vmatmul.mubr.msk.f32.gmra.mrb[6].mxu1 %vm156_vm0, %v5987_v17 }
  0x29   :  { %4528 = vmatprep.mubr.msk.f32.mxu1 %vm156_vm0, %v5992_v18 }
  0x2a   :  { %4545 = vmatmul.mubr.msk.f32.vlgmr.msra.gmra.mrb[16].mxu0 %vm156_vm0, %v5933_v5  ;;  %128 = vperm.xlu0 %5305, %v68_v48  }
  0x2b   :  { %4547 = vmatprep.mubr.msk.f32.mxu0 %vm156_vm0, %v5938_v6  ;;  %4977 = vmatpush3.bf16.msra.mxu0 %v4974_v13  ;;  %v6421_v13 = vld [vmem:[%s7095_s2 + $0x68] sm:$0xff] }
  0x2c   :  { %4983 = vmatprep.subr.bf16.mxu0 %v6061_v31  ;;  %133 = vperm.xlu1 %5306, %v69_v49  }
  0x2d   :  { %4529 = vmatmul.mubr.msk.f32.gmra.mrb[8].mxu1 %vm156_vm0, %v6001_v19 }
  0x2e   :  { %4548 = vmatmul.mubr.msk.f32.gmra.mrb[18].mxu0 %vm156_vm0, %v5959_v12  ;;  %148 = vperm.xlu0 %5305, %v72_v50  }
  0x2f   :  { %4550 = vmatprep.mubr.msk.f32.mxu0 %vm156_vm0, %v5964_v14  ;;  %4531 = vmatprep.mubr.msk.f32.mxu1 %vm156_vm0, %v6006_v20 }
  0x30   :  { %153 = vperm.xlu1 %5306, %v73_v51  }
  0x31   :  { %4532 = vmatmul.mubr.msk.f32.gmra.mrb[10].mxu1 %vm156_vm0, %v6015_v21 }
  0x32   :  { %4551 = vmatmul.mubr.msk.f32.gmra.mrb[20].mxu0 %vm156_vm0, %v5973_v15  ;;  %3760 = vperm.xlu0 %5305, %v3754_v52  }
  0x33   :  { %4553 = vmatprep.mubr.msk.f32.mxu0 %vm156_vm0, %v5978_v16  ;;  %4534 = vmatprep.mubr.msk.f32.mxu1 %vm156_vm0, %v6020_v22 }
  0x34   :  { %3765 = vperm.xlu1 %5306, %v3755_v53  }
  0x35   :  { %4535 = vmatmul.mubr.msk.f32.gmra.mrb[12].mxu1 %vm156_vm0, %v6029_v23 }
  0x36   :  { %4554 = vmatmul.mubr.msk.f32.gmra.mrb[22].mxu0 %vm156_vm0, %v5987_v17  ;;  %3770 = vperm.xlu0 %5305, %v3756_v57  }
  0x37   :  { %4556 = vmatprep.mubr.msk.f32.mxu0 %vm156_vm0, %v5992_v18  ;;  %4537 = vmatprep.mubr.msk.f32.mxu1 %vm156_vm0, %v6034_v24 }
  0x38   :  { %3775 = vperm.xlu1 %5306, %v3757_v58  }
  0x39   :  { %4538 = vmatmul.mubr.msk.f32.gmra.mrb[14].mxu1 %vm156_vm0, %v6043_v25 }
  0x3a   :  { %4557 = vmatmul.mubr.msk.f32.gmra.mrb[24].mxu0 %vm156_vm0, %v6001_v19  ;;  %3794 = vperm.xlu0 %5305, %v3791_v60  }
  0x3b   :  { %4559 = vmatprep.mubr.msk.f32.mxu0 %vm156_vm0, %v6006_v20  ;;  %4572 = vmatprep.mubr.msk.f32.mxu1 %vm156_vm0, %v5924_v3 }
  0x3d   :  { %4573 = vmatmul.mubr.msk.f32.vlgmr.msra.gmra.mrb[16].mxu1 %vm156_vm0, %v5933_v5 }
  0x3e   :  { %4560 = vmatmul.mubr.msk.f32.gmra.mrb[26].mxu0 %vm156_vm0, %v6015_v21  ;;  %4575 = vmatprep.mubr.msk.f32.mxu1 %vm156_vm0, %v5938_v6 }
  0x3f   :  { %4562 = vmatprep.mubr.msk.f32.mxu0 %vm156_vm0, %v6020_v22  ;;  %4981 = vmatpush3.bf16.msra.mxu1 %v4978_v56 }
  0x40   :  { %4987 = vmatprep.subr.bf16.mxu1 %v4986_v30 }
  0x41   :  { %4576 = vmatmul.mubr.msk.f32.gmra.mrb[18].mxu1 %vm156_vm0, %v5959_v12 }
  0x42   :  { %4563 = vmatmul.mubr.msk.f32.gmra.mrb[28].mxu0 %vm156_vm0, %v6029_v23  ;;  %4578 = vmatprep.mubr.msk.f32.mxu1 %vm156_vm0, %v5964_v14 }
  0x43   :  { %4565 = vmatprep.mubr.msk.f32.mxu0 %vm156_vm0, %v6034_v24 }
  0x45   :  { %4579 = vmatmul.mubr.msk.f32.gmra.mrb[20].mxu1 %vm156_vm0, %v5973_v15 }
  0x46   :  { %4566 = vmatmul.mubr.msk.f32.gmra.mrb[30].mxu0 %vm156_vm0, %v6043_v25  ;;  %4581 = vmatprep.mubr.msk.f32.mxu1 %vm156_vm0, %v5978_v16 }
  0x47   :  { %4600 = vmatprep.mubr.msk.f32.mxu0 %vm156_vm0, %v5924_v3 }
  0x49   :  { %4582 = vmatmul.mubr.msk.f32.gmra.mrb[22].mxu1 %vm156_vm0, %v5987_v17 }
  0x4a   :  { %4601 = vmatmul.mubr.msk.f32.vlgmr.msra.gmra.mrb[32].mxu0 %vm156_vm0, %v5933_v5  ;;  %4584 = vmatprep.mubr.msk.f32.mxu1 %vm156_vm0, %v5992_v18 }
  0x4b   :  { %4603 = vmatprep.mubr.msk.f32.mxu0 %vm156_vm0, %v5938_v6  ;;  %4985 = vmatpush3.bf16.msra.mxu0 %v6061_v31 }
  0x4c   :  { %4708 = vmatprep.subr.mxu0 %v5875_v59 }
  0x4d   :  { %4585 = vmatmul.mubr.msk.f32.gmra.mrb[24].mxu1 %vm156_vm0, %v6001_v19 }
  0x4e   :  { %4604 = vmatmul.mubr.msk.f32.gmra.mrb[34].mxu0 %vm156_vm0, %v5959_v12  ;;  %4587 = vmatprep.mubr.msk.f32.mxu1 %vm156_vm0, %v6006_v20 }
  0x4f   :  { %4606 = vmatprep.mubr.msk.f32.mxu0 %vm156_vm0, %v5964_v14 }
  0x51   :  { %4588 = vmatmul.mubr.msk.f32.gmra.mrb[26].mxu1 %vm156_vm0, %v6015_v21 }
  0x52   :  { %4607 = vmatmul.mubr.msk.f32.gmra.mrb[36].mxu0 %vm156_vm0, %v5973_v15  ;;  %4590 = vmatprep.mubr.msk.f32.mxu1 %vm156_vm0, %v6020_v22 }
  0x53   :  { %4609 = vmatprep.mubr.msk.f32.mxu0 %vm156_vm0, %v5978_v16 }
  0x55   :  { %4591 = vmatmul.mubr.msk.f32.gmra.mrb[28].mxu1 %vm156_vm0, %v6029_v23 }
  0x56   :  { %4610 = vmatmul.mubr.msk.f32.gmra.mrb[38].mxu0 %vm156_vm0, %v5987_v17  ;;  %4593 = vmatprep.mubr.msk.f32.mxu1 %vm156_vm0, %v6034_v24 }
  0x57   :  { %4612 = vmatprep.mubr.msk.f32.mxu0 %vm156_vm0, %v5992_v18 }
  0x59   :  { %4594 = vmatmul.mubr.msk.f32.gmra.mrb[30].mxu1 %vm156_vm0, %v6043_v25 }
  0x5a   :  { %4613 = vmatmul.mubr.msk.f32.gmra.mrb[40].mxu0 %vm156_vm0, %v6001_v19  ;;  %4628 = vmatprep.mubr.msk.f32.mxu1 %vm156_vm0, %v5924_v3 }
  0x5b   :  { %4615 = vmatprep.mubr.msk.f32.mxu0 %vm156_vm0, %v6006_v20 }
  0x5d   :  { %4629 = vmatmul.mubr.msk.f32.vlgmr.msra.gmra.mrb[32].mxu1 %vm156_vm0, %v5933_v5 }
  0x5e   :  { %4616 = vmatmul.mubr.msk.f32.gmra.mrb[42].mxu0 %vm156_vm0, %v6015_v21  ;;  %4631 = vmatprep.mubr.msk.f32.mxu1 %vm156_vm0, %v5938_v6 }
  0x5f   :  { %4618 = vmatprep.mubr.msk.f32.mxu0 %vm156_vm0, %v6020_v22  ;;  %4989 = vmatpush3.bf16.msra.mxu1 %v4986_v30 }
  0x61   :  { %4632 = vmatmul.mubr.msk.f32.gmra.mrb[34].mxu1 %vm156_vm0, %v5959_v12 }
  0x62   :  { %4619 = vmatmul.mubr.msk.f32.gmra.mrb[44].mxu0 %vm156_vm0, %v6029_v23  ;;  %4634 = vmatprep.mubr.msk.f32.mxu1 %vm156_vm0, %v5964_v14 }
  0x63   :  { %4621 = vmatprep.mubr.msk.f32.mxu0 %vm156_vm0, %v6034_v24 }
  0x65   :  { %4635 = vmatmul.mubr.msk.f32.gmra.mrb[36].mxu1 %vm156_vm0, %v5973_v15 }
  0x66   :  { %4622 = vmatmul.mubr.msk.f32.gmra.mrb[46].mxu0 %vm156_vm0, %v6043_v25  ;;  %4637 = vmatprep.mubr.msk.f32.mxu1 %vm156_vm0, %v5978_v16 }
  0x67   :  { %4656 = vmatprep.mubr.msk.f32.mxu0 %vm156_vm0, %v5924_v3 }
  0x69   :  { %4638 = vmatmul.mubr.msk.f32.gmra.mrb[38].mxu1 %vm156_vm0, %v5987_v17 }
  0x6a   :  { %4657 = vmatmul.mubr.msk.f32.vlgmr.msra.gmra.mrb[48].mxu0 %vm156_vm0, %v5933_v5  ;;  %4640 = vmatprep.mubr.msk.f32.mxu1 %vm156_vm0, %v5992_v18 }
  0x6b   :  { %4659 = vmatprep.mubr.msk.f32.mxu0 %vm156_vm0, %v5938_v6  ;;  %4709 = vmatpush3.msra.mxu0 %v5875_v59 }
  0x6d   :  { %4641 = vmatmul.mubr.msk.f32.gmra.mrb[40].mxu1 %vm156_vm0, %v6001_v19 }
  0x6e   :  { %4660 = vmatmul.mubr.msk.f32.gmra.mrb[50].mxu0 %vm156_vm0, %v5959_v12  ;;  %4643 = vmatprep.mubr.msk.f32.mxu1 %vm156_vm0, %v6006_v20 }
  0x6f   :  { %4662 = vmatprep.mubr.msk.f32.mxu0 %vm156_vm0, %v5964_v14 }
  0x71   :  { %4644 = vmatmul.mubr.msk.f32.gmra.mrb[42].mxu1 %vm156_vm0, %v6015_v21 }
  0x72   :  { %4663 = vmatmul.mubr.msk.f32.gmra.mrb[52].mxu0 %vm156_vm0, %v5973_v15  ;;  %4646 = vmatprep.mubr.msk.f32.mxu1 %vm156_vm0, %v6020_v22 }
  0x73   :  { %4665 = vmatprep.mubr.msk.f32.mxu0 %vm156_vm0, %v5978_v16 }
  0x75   :  { %4647 = vmatmul.mubr.msk.f32.gmra.mrb[44].mxu1 %vm156_vm0, %v6029_v23 }
  0x76   :  { %4666 = vmatmul.mubr.msk.f32.gmra.mrb[54].mxu0 %vm156_vm0, %v5987_v17  ;;  %4649 = vmatprep.mubr.msk.f32.mxu1 %vm156_vm0, %v6034_v24 }
  0x77   :  { %4668 = vmatprep.mubr.msk.f32.mxu0 %vm156_vm0, %v5992_v18 }
  0x79   :  { %4650 = vmatmul.mubr.msk.f32.gmra.mrb[46].mxu1 %vm156_vm0, %v6043_v25 }
  0x7a   :  { %4669 = vmatmul.mubr.msk.f32.gmra.mrb[56].mxu0 %vm156_vm0, %v6001_v19  ;;  %4684 = vmatprep.mubr.msk.f32.mxu1 %vm156_vm0, %v5924_v3  ;;  %v6393_v3 = vld [vmem:[%s7095_s2 + $0x48] sm:$0xff] }
  0x7b   :  { %4671 = vmatprep.mubr.msk.f32.mxu0 %vm156_vm0, %v6006_v20 }
  0x7d   :  { %4685 = vmatmul.mubr.msk.f32.vlgmr.msra.gmra.mrb[48].mxu1 %vm156_vm0, %v5933_v5 }
  0x7e   :  { %4672 = vmatmul.mubr.msk.f32.gmra.mrb[58].mxu0 %vm156_vm0, %v6015_v21  ;;  %4687 = vmatprep.mubr.msk.f32.mxu1 %vm156_vm0, %v5938_v6 }
  0x7f   :  { %4674 = vmatprep.mubr.msk.f32.mxu0 %vm156_vm0, %v6020_v22 }
  0x81   :  { %4688 = vmatmul.mubr.msk.f32.gmra.mrb[50].mxu1 %vm156_vm0, %v5959_v12 }
  0x82   :  { %4675 = vmatmul.mubr.msk.f32.gmra.mrb[60].mxu0 %vm156_vm0, %v6029_v23  ;;  %4690 = vmatprep.mubr.msk.f32.mxu1 %vm156_vm0, %v5964_v14 }
  0x83   :  { %4677 = vmatprep.mubr.msk.f32.mxu0 %vm156_vm0, %v6034_v24 }
  0x85   :  { %4691 = vmatmul.mubr.msk.f32.gmra.mrb[52].mxu1 %vm156_vm0, %v5973_v15 }
  0x86   :  { %4678 = vmatmul.mubr.msk.f32.gmra.mrb[62].mxu0 %vm156_vm0, %v6043_v25  ;;  %4693 = vmatprep.mubr.msk.f32.mxu1 %vm156_vm0, %v5978_v16 }
  0x87   :  { %4710 = vmatprep.mubr.msk.f32.mxu0 %vm1537_vm1, %v6312_v61 }
  0x89   :  { %4694 = vmatmul.mubr.msk.f32.gmra.mrb[54].mxu1 %vm156_vm0, %v5987_v17 }
  0x8a   :  { %4711 = vmatmul.mubr.msk.f32.vlgmr.msra.gmra.mrb[0].mxu0 %vm1537_vm1, %v6325_v62  ;;  %4696 = vmatprep.mubr.msk.f32.mxu1 %vm156_vm0, %v5992_v18 }
  0x8b   :  { %4713 = vmatprep.mubr.msk.f32.mxu0 %vm1537_vm1, %v6330_v63 }
  0x8d   :  { %4697 = vmatmul.mubr.msk.f32.gmra.mrb[56].mxu1 %vm156_vm0, %v6001_v19 }
  0x8e   :  { %4714 = vmatmul.mubr.msk.f32.gmra.mrb[2].mxu0 %vm1537_vm1, %v6343_v0  ;;  %4699 = vmatprep.mubr.msk.f32.mxu1 %vm156_vm0, %v6006_v20 }
  0x8f   :  { %4716 = vmatprep.mubr.msk.f32.mxu0 %vm1537_vm1, %v6348_v1 }
  0x91   :  { %4700 = vmatmul.mubr.msk.f32.gmra.mrb[58].mxu1 %vm156_vm0, %v6015_v21  ;;  %v6481_v6 = vpop.permute.xlu0 %78 }
  0x92   :  { %4717 = vmatmul.mubr.msk.f32.gmra.mrb[4].mxu0 %vm1537_vm1, %v6361_v2  ;;  %4702 = vmatprep.mubr.msk.f32.mxu1 %vm156_vm0, %v6020_v22  ;;  %v6479_v5 = vpop.permute.xlu1 %98 }
  0x93   :  { %4719 = vmatprep.mubr.msk.f32.mxu0 %vm1537_vm1, %v6366_v4 }
  0x95   :  { %4703 = vmatmul.mubr.msk.f32.gmra.mrb[60].mxu1 %vm156_vm0, %v6029_v23  ;;  %v6485_v14 = vpop.permute.xlu0 %83 }
  0x96   :  { %4720 = vmatmul.mubr.msk.f32.gmra.mrb[6].mxu0 %vm1537_vm1, %v6379_v7  ;;  %4705 = vmatprep.mubr.msk.f32.mxu1 %vm156_vm0, %v6034_v24  ;;  %v6483_v12 = vpop.permute.xlu1 %103 }
  0x97   :  { %4722 = vmatprep.mubr.msk.f32.mxu0 %vm1537_vm1, %v6384_v8 }
  0x99   :  { %4706 = vmatmul.mubr.msk.f32.gmra.mrb[62].mxu1 %vm156_vm0, %v6043_v25  ;;  %v6489_v16 = vpop.permute.xlu0 %88 }
  0x9a   :  { %4723 = vmatmul.mubr.msk.f32.gmra.mrb[8].mxu0 %vm1537_vm1, %v6393_v3  ;;  %4742 = vmatprep.mubr.msk.f32.mxu1 %vm1537_vm1, %v6312_v61  ;;  %v6487_v15 = vpop.permute.xlu1 %93 }
  0x9b   :  { %4725 = vmatprep.mubr.msk.f32.mxu0 %vm1537_vm1, %v6398_v9 }
  0x9d   :  { %v6495_v22 = vpop.permute.xlu0 %108 }
  0x9e   :  { %4726 = vmatmul.mubr.msk.f32.gmra.mrb[10].mxu0 %vm1537_vm1, %v6407_v10  ;;  %v6492_v20 = vpop.permute.xlu1 %113 }
  0x9f   :  { %4728 = vmatprep.mubr.msk.f32.mxu0 %vm1537_vm1, %v6412_v11 }
  0xa1   :  { %v6501_v37 = vpop.permute.xlu0 %118 }
  0xa2   :  { %4729 = vmatmul.mubr.msk.f32.gmra.mrb[12].mxu0 %vm1537_vm1, %v6421_v13  ;;  %v6498_v34 = vpop.permute.xlu1 %123 }
  0xa3   :  { %4731 = vmatprep.mubr.msk.f32.mxu0 %vm1537_vm1, %v6426_v26 }
  0xa5   :  { %v6509_v50 = vpop.permute.xlu0 %138 }
  0xa6   :  { %4732 = vmatmul.mubr.msk.f32.gmra.mrb[14].mxu0 %vm1537_vm1, %v6435_v27  ;;  %v6506_v47 = vpop.permute.xlu1 %143 }
  0xa7   :  { %4774 = vmatprep.mubr.msk.f32.mxu0 %vm1537_vm1, %v6312_v61 }
  0xab   :  { %v6513_v29 = vpop.permute.xlu1 %133 }
 0x15d   :  { %v4712_v17 = vpop.f32.mrb[0].mxu0 }
 0x15e   :  { %v5046_v18 = vadd.f32 %v4712_v17, %v6485_v14  ;;  %v1652_v19 = vpop.f32.mrb[1].mxu0 }
 0x15f   :  { %v5047_v21 = vadd.f32 %v1652_v19, %v6481_v6  ;;  %v6515_v19 = vpop.permute.xlu0 %128 }
 0x160   :  { %v3976_v23 = vmul.f32 -1.442695, %v5046_v18 }
 0x161   :  { %v3975_v24 = vmul.f32 -1.442695, %v5047_v21  ;;  %v4715_v25 = vpop.f32.mrb[2].mxu0 }
 0x162   :  { %5307 = vpow2.f32 %v3976_v23  ;;  %v5048_v31 = vadd.f32 %v4715_v25, %v6487_v15  ;;  %v1662_v32 = vpop.f32.mrb[3].mxu0 }
 0x163   :  { %5309 = vpow2.f32 %v3975_v24  ;;  %v5049_v35 = vadd.f32 %v1662_v32, %v6489_v16 }
 0x164   :  { %v3978_v33 = vmul.f32 -1.442695, %v5048_v31 }
 0x165   :  { %v4718_v36 = vpop.f32.mrb[4].mxu0  ;;  %v3977_v42 = vmul.f32 -1.442695, %v5049_v35 }
 0x166   :  { %5311 = vpow2.f32 %v3978_v33  ;;  %v5050_v38 = vadd.f32 %v4718_v36, %v6483_v12  ;;  %v1672_v39 = vpop.f32.mrb[5].mxu0 }
 0x167   :  { %v5051_v40 = vadd.f32 %v1672_v39, %v6479_v5 }
 0x168   :  { %v3980_v41 = vmul.f32 -1.442695, %v5050_v38 }
 0x169   :  { %v3979_v43 = vmul.f32 -1.442695, %v5051_v40  ;;  %v4721_v44 = vpop.f32.mrb[6].mxu0 }
 0x16a   :  { %5313 = vpow2.f32 %v3980_v41  ;;  %v5052_v45 = vadd.f32 %v4721_v44, %v6492_v20  ;;  %v1682_v46 = vpop.f32.mrb[7].mxu0  ;;  %v6521_v44 = vpop.permute.xlu1 %153 }
 0x16b   :  { %5315 = vpow2.f32 %v3979_v43  ;;  %v5053_v48 = vadd.f32 %v1682_v46, %v6495_v22 }
 0x16c   :  { %v5308_v49 = vpop.eup %5307  ;;  %v3982_v51 = vmul.f32 -1.442695, %v5052_v45  ;;  %5317 = vpow2.f32 %v3977_v42 }
 0x16d   :  { %v5310_v52 = vpop.eup %5309  ;;  %v1784_v53 = vadd.f32 1.0, %v5308_v49  ;;  %v3981_v54 = vmul.f32 -1.442695, %v5053_v48  ;;  %v4724_v55 = vpop.f32.mrb[8].mxu0 }
 0x16e   :  { %v1783_v56 = vadd.f32 1.0, %v5310_v52  ;;  %5319 = vpow2.f32 %v3982_v51  ;;  %v5054_v57 = vadd.f32 %v4724_v55, %v6498_v34  ;;  %v1692_v58 = vpop.f32.mrb[9].mxu0 }
 0x16f   :  { %v5055_v59 = vadd.f32 %v1692_v58, %v6501_v37  ;;  %5321 = vrcp.f32 %v1784_v53  ;;  %v6524_v53 = vpop.permute.xlu0 %148 }
 0x170   :  { %v5312_v60 = vpop.eup %5311  ;;  %v3984_v28 = vmul.f32 -1.442695, %v5054_v57  ;;  %5323 = vpow2.f32 %v3981_v54 }
 0x171   :  { %v1786_v30 = vadd.f32 1.0, %v5312_v60  ;;  %v3983_v17 = vmul.f32 -1.442695, %v5055_v59  ;;  %v4727_v18 = vpop.f32.mrb[10].mxu0  ;;  %5325 = vrcp.f32 %v1783_v56 }
 0x172   :  { %v5056_v21 = vadd.f32 %v4727_v18, %v6513_v29  ;;  %v1702_v23 = vpop.f32.mrb[11].mxu0  ;;  %5327 = vpow2.f32 %v3984_v28 }
 0x173   :  { %v5057_v24 = vadd.f32 %v1702_v23, %v6515_v19  ;;  %5329 = vrcp.f32 %v1786_v30 }
 0x174   :  { %v5314_v25 = vpop.eup %5313  ;;  %v3986_v31 = vmul.f32 -1.442695, %v5056_v21  ;;  %5331 = vpow2.f32 %v3983_v17 }
 0x175   :  { %v5316_v32 = vpop.eup %5315  ;;  %v1788_v33 = vadd.f32 1.0, %v5314_v25  ;;  %v3985_v35 = vmul.f32 -1.442695, %v5057_v24  ;;  %v4730_v36 = vpop.f32.mrb[12].mxu0 }
 0x176   :  { %v1787_v38 = vadd.f32 1.0, %v5316_v32  ;;  %5333 = vpow2.f32 %v3986_v31  ;;  %v5058_v39 = vadd.f32 %v4730_v36, %v6506_v47  ;;  %v1712_v40 = vpop.f32.mrb[13].mxu0  ;;  %v5318_v41 = vpop.eup %5317 }
 0x177   :  { %5335 = vrcp.f32 %v1788_v33  ;;  %v5059_v43 = vadd.f32 %v1712_v40, %v6509_v50  ;;  %v1785_v54 = vadd.f32 1.0, %v5318_v41 }
 0x178   :  { %v5320_v42 = vpop.eup %5319  ;;  %5337 = vrcp.f32 %v1787_v38 }
 0x179   :  { %v1790_v45 = vadd.f32 1.0, %v5320_v42  ;;  %5339 = vpow2.f32 %v3985_v35  ;;  %v4733_v46 = vpop.f32.mrb[14].mxu0  ;;  %v5322_v48 = vpop.eup %5321 }
 0x17a   :  { %5341 = vtanh.f32 %v5058_v39  ;;  %v5060_v49 = vadd.f32 %v4733_v46, %v6521_v44  ;;  %v1722_v51 = vpop.f32.mrb[15].mxu0  ;;  %v5324_v52 = vpop.eup %5323 }
 0x17b   :  { %5343 = vrcp.f32 %v1790_v45  ;;  %v5326_v55 = vpop.eup %5325  ;;  %v1789_v56 = vadd.f32 1.0, %v5324_v52  ;;  %v5061_v57 = vadd.f32 %v1722_v51, %v6524_v53 }
 0x17c   :  { %5345 = vtanh.f32 %v5059_v43  ;;  %v5328_v58 = vpop.eup %5327 }
 0x17d   :  { %5347 = vtanh.f32 %v5060_v49  ;;  %v5330_v59 = vpop.eup %5329  ;;  %v1792_v24 = vadd.f32 1.0, %v5328_v58 }
 0x17e   :  { %5349 = vrcp.f32 %v1789_v56  ;;  %v5332_v60 = vpop.eup %5331 }
 0x17f   :  { %5351 = vrcp.f32 %v1785_v54  ;;  %v1791_v36 = vadd.f32 1.0, %v5332_v60 }
 0x180   :  { %v5334_v28 = vpop.eup %5333  ;;  %5353 = vtanh.f32 %v5061_v57 }
 0x181   :  { %v5336_v30 = vpop.eup %5335  ;;  %5355 = vrcp.f32 %v1792_v24  ;;  %v1794_v46 = vadd.f32 1.0, %v5334_v28 }
 0x182   :  { %v5338_v17 = vpop.eup %5337  ;;  %v1824_v21 = vmul.f32 0.0, %v5336_v30 }
 0x183   :  { %v5340_v18 = vpop.eup %5339  ;;  %v1823_v31 = vmul.f32 0.0, %v5338_v17 }
 0x184   :  { %v5342_v23 = vpop.eup %5341 }
 0x185   :  { %v5344_v25 = vpop.eup %5343  ;;  %v1828_v32 = vmul.f32 %v5342_v23, %v5322_v48  ;;  %v1793_v48 = vadd.f32 1.0, %v5340_v18 }
 0x186   :  { %v5346_v33 = vpop.eup %5345  ;;  %v1826_v35 = vmul.f32 0.0, %v5344_v25 }
 0x187   :  { %v5348_v38 = vpop.eup %5347  ;;  %v6527_v39 = vadd.f32 %v1828_v32, %v1824_v21  ;;  %v1827_v40 = vmul.f32 %v5346_v33, %v5326_v55 }
 0x188   :  { %v5350_v41 = vpop.eup %5349  ;;  %v1830_v42 = vmul.f32 %v5348_v38, %v5330_v59 }
 0x189   :  { %v5352_v43 = vpop.eup %5351  ;;  %v1825_v45 = vmul.f32 0.0, %v5350_v41  ;;  %5357 = vtanh.f32 %v6527_v39  ;;  %v6530_v49 = vadd.f32 %v1827_v40, %v1823_v31 }
 0x18a   :  { %v5354_v51 = vpop.eup %5353  ;;  %5359 = vrcp.f32 %v1791_v36  ;;  %v6532_v52 = vadd.f32 %v1830_v42, %v1826_v35 }
 0x18b   :  { %5361 = vtanh.f32 %v6530_v49  ;;  %v1829_v54 = vmul.f32 %v5354_v51, %v5352_v43  ;;  %v5356_v56 = vpop.eup %5355 }
 0x18c   :  { %5363 = vtanh.f32 %v6532_v52 }
 0x18d   :  { %5365 = vrcp.f32 %v1794_v46  ;;  %v6536_v55 = vadd.f32 %v1829_v54, %v1825_v45 }
 0x18e   :  { %5367 = vrcp.f32 %v1793_v48 }
 0x18f   :  { %5369 = vtanh.f32 %v6536_v55 }
 0x193   :  { %v5358_v57 = vpop.eup %5357 }
 0x194   :  { %v5360_v58 = vpop.eup %5359  ;;  %v1840_v59 = vmul.f32 %v5358_v57, %v5356_v56 }
 0x195   :  { %v5362_v60 = vpop.eup %5361 }
 0x196   :  { %v5364_v28 = vpop.eup %5363  ;;  %v1839_v30 = vmul.f32 %v5362_v60, %v5360_v58 }
 0x197   :  { %v5366_v17 = vpop.eup %5365 }
 0x198   :  { %v5368_v18 = vpop.eup %5367  ;;  %v4990_v21 = vpack.c.bf16 %v1840_v59, %v1839_v30  ;;  %v1842_v23 = vmul.f32 %v5366_v17, %v5364_v28 }
 0x199   :  { %v5370_v24 = vpop.eup %5369 }
 0x19a   :  { %4991 = vmatprep.subr.bf16.mxu1 %v4990_v21  ;;  %v1841_v25 = vmul.f32 %v5370_v24, %v5368_v18 }
 0x19b   :  { %4993 = vmatpush3.bf16.msra.mxu1 %v4990_v21 }
 0x19c   :  { %v4994_v31 = vpack.c.bf16 %v1842_v23, %v1841_v25 }
 0x19e   :  { %4995 = vmatprep.subr.bf16.mxu1 %v4994_v31 }
 0x19f   :  { %4997 = vmatpush3.bf16.msra.mxu1 %v4994_v31 }
 0x1a2   :  { %4743 = vmatmul.mubr.msk.f32.vlgmr.msra.gmra.mrb[0].mxu1 %vm1537_vm1, %v6325_v62 }
 0x1a3   :  { %4745 = vmatprep.mubr.msk.f32.mxu1 %vm1537_vm1, %v6330_v63 }
 0x1a6   :  { %4746 = vmatmul.mubr.msk.f32.gmra.mrb[2].mxu1 %vm1537_vm1, %v6343_v0 }
 0x1a7   :  { %4748 = vmatprep.mubr.msk.f32.mxu1 %vm1537_vm1, %v6348_v1 }
 0x1aa   :  { %4749 = vmatmul.mubr.msk.f32.gmra.mrb[4].mxu1 %vm1537_vm1, %v6361_v2 }
 0x1ab   :  { %4751 = vmatprep.mubr.msk.f32.mxu1 %vm1537_vm1, %v6366_v4 }
 0x1ae   :  { %4752 = vmatmul.mubr.msk.f32.gmra.mrb[6].mxu1 %vm1537_vm1, %v6379_v7 }
 0x1af   :  { %4754 = vmatprep.mubr.msk.f32.mxu1 %vm1537_vm1, %v6384_v8 }
 0x1b2   :  { %4755 = vmatmul.mubr.msk.f32.gmra.mrb[8].mxu1 %vm1537_vm1, %v6393_v3 }
 0x1b3   :  { %4757 = vmatprep.mubr.msk.f32.mxu1 %vm1537_vm1, %v6398_v9 }
 0x1b6   :  { %4758 = vmatmul.mubr.msk.f32.gmra.mrb[10].mxu1 %vm1537_vm1, %v6407_v10 }
 0x1b7   :  { %4760 = vmatprep.mubr.msk.f32.mxu1 %vm1537_vm1, %v6412_v11 }
 0x1ba   :  { %4761 = vmatmul.mubr.msk.f32.gmra.mrb[12].mxu1 %vm1537_vm1, %v6421_v13 }
 0x1bb   :  { %4763 = vmatprep.mubr.msk.f32.mxu1 %vm1537_vm1, %v6426_v26 }
 0x1be   :  { %4764 = vmatmul.mubr.msk.f32.gmra.mrb[14].mxu1 %vm1537_vm1, %v6435_v27 }
 0x1bf   :  { %4806 = vmatprep.mubr.msk.f32.mxu1 %vm1537_vm1, %v6312_v61 }
 0x275   :  { %v4744_v32 = vpop.f32.mrb[0].mxu1 }
 0x276   :  { %v5062_v33 = vadd.f32 %v4744_v32, %v6485_v14  ;;  %v1925_v35 = vpop.f32.mrb[1].mxu1 }
 0x277   :  { %v5063_v36 = vadd.f32 %v1925_v35, %v6481_v6 }
 0x278   :  { %v4004_v38 = vmul.f32 -1.442695, %v5062_v33 }
 0x279   :  { %v4003_v40 = vmul.f32 -1.442695, %v5063_v36  ;;  %v4747_v41 = vpop.f32.mrb[2].mxu1 }
 0x27a   :  { %5371 = vpow2.f32 %v4004_v38  ;;  %v5064_v42 = vadd.f32 %v4747_v41, %v6487_v15  ;;  %v1935_v43 = vpop.f32.mrb[3].mxu1 }
 0x27b   :  { %5373 = vpow2.f32 %v4003_v40  ;;  %v5065_v46 = vadd.f32 %v1935_v43, %v6489_v16 }
 0x27c   :  { %v4006_v45 = vmul.f32 -1.442695, %v5064_v42 }
 0x27d   :  { %v4750_v51 = vpop.f32.mrb[4].mxu1  ;;  %v4005_v58 = vmul.f32 -1.442695, %v5065_v46 }
 0x27e   :  { %5375 = vpow2.f32 %v4006_v45  ;;  %v5066_v48 = vadd.f32 %v4750_v51, %v6483_v12  ;;  %v1945_v54 = vpop.f32.mrb[5].mxu1 }
 0x27f   :  { %v5067_v56 = vadd.f32 %v1945_v54, %v6479_v5 }
 0x280   :  { %v4008_v57 = vmul.f32 -1.442695, %v5066_v48 }
 0x281   :  { %v4007_v59 = vmul.f32 -1.442695, %v5067_v56  ;;  %v4753_v60 = vpop.f32.mrb[6].mxu1 }
 0x282   :  { %5377 = vpow2.f32 %v4008_v57  ;;  %v5068_v28 = vadd.f32 %v4753_v60, %v6492_v20  ;;  %v1955_v30 = vpop.f32.mrb[7].mxu1 }
 0x283   :  { %5379 = vpow2.f32 %v4007_v59  ;;  %v5069_v17 = vadd.f32 %v1955_v30, %v6495_v22 }
 0x284   :  { %v5372_v18 = vpop.eup %5371  ;;  %v4010_v21 = vmul.f32 -1.442695, %v5068_v28  ;;  %5381 = vpow2.f32 %v4005_v58 }
 0x285   :  { %v5374_v23 = vpop.eup %5373  ;;  %v2057_v24 = vadd.f32 1.0, %v5372_v18  ;;  %v4009_v25 = vmul.f32 -1.442695, %v5069_v17  ;;  %v4756_v31 = vpop.f32.mrb[8].mxu1 }
 0x286   :  { %v2056_v32 = vadd.f32 1.0, %v5374_v23  ;;  %5383 = vpow2.f32 %v4010_v21  ;;  %v5070_v33 = vadd.f32 %v4756_v31, %v6498_v34  ;;  %v1965_v35 = vpop.f32.mrb[9].mxu1 }
 0x287   :  { %v5071_v36 = vadd.f32 %v1965_v35, %v6501_v37  ;;  %5385 = vrcp.f32 %v2057_v24 }
 0x288   :  { %v5376_v38 = vpop.eup %5375  ;;  %v4012_v40 = vmul.f32 -1.442695, %v5070_v33  ;;  %5387 = vpow2.f32 %v4009_v25 }
 0x289   :  { %v2059_v41 = vadd.f32 1.0, %v5376_v38  ;;  %v4011_v42 = vmul.f32 -1.442695, %v5071_v36  ;;  %v4759_v43 = vpop.f32.mrb[10].mxu1  ;;  %5389 = vrcp.f32 %v2056_v32 }
 0x28a   :  { %v5072_v45 = vadd.f32 %v4759_v43, %v6513_v29  ;;  %v1975_v46 = vpop.f32.mrb[11].mxu1  ;;  %5391 = vpow2.f32 %v4012_v40 }
 0x28b   :  { %v5073_v51 = vadd.f32 %v1975_v46, %v6515_v19  ;;  %5393 = vrcp.f32 %v2059_v41 }
 0x28c   :  { %v5378_v48 = vpop.eup %5377  ;;  %v4014_v54 = vmul.f32 -1.442695, %v5072_v45  ;;  %5395 = vpow2.f32 %v4011_v42 }
 0x28d   :  { %v5380_v56 = vpop.eup %5379  ;;  %v2061_v57 = vadd.f32 1.0, %v5378_v48  ;;  %v4013_v58 = vmul.f32 -1.442695, %v5073_v51  ;;  %v4762_v59 = vpop.f32.mrb[12].mxu1 }
 0x28e   :  { %v2060_v60 = vadd.f32 1.0, %v5380_v56  ;;  %5397 = vpow2.f32 %v4014_v54  ;;  %v5074_v28 = vadd.f32 %v4762_v59, %v6506_v47  ;;  %v1985_v30 = vpop.f32.mrb[13].mxu1  ;;  %v5382_v17 = vpop.eup %5381 }
 0x28f   :  { %5399 = vrcp.f32 %v2061_v57  ;;  %v5075_v21 = vadd.f32 %v1985_v30, %v6509_v50  ;;  %v2058_v35 = vadd.f32 1.0, %v5382_v17 }
 0x290   :  { %v5384_v18 = vpop.eup %5383  ;;  %5401 = vrcp.f32 %v2060_v60 }
 0x291   :  { %v2063_v23 = vadd.f32 1.0, %v5384_v18  ;;  %5403 = vpow2.f32 %v4013_v58  ;;  %v4765_v24 = vpop.f32.mrb[14].mxu1  ;;  %v5386_v25 = vpop.eup %5385 }
 0x292   :  { %5405 = vtanh.f32 %v5074_v28  ;;  %v5076_v31 = vadd.f32 %v4765_v24, %v6521_v44  ;;  %v1995_v32 = vpop.f32.mrb[15].mxu1  ;;  %v5388_v33 = vpop.eup %5387 }
 0x293   :  { %5407 = vrcp.f32 %v2063_v23  ;;  %v5390_v36 = vpop.eup %5389  ;;  %v2062_v38 = vadd.f32 1.0, %v5388_v33  ;;  %v5077_v40 = vadd.f32 %v1995_v32, %v6524_v53 }
 0x294   :  { %5409 = vtanh.f32 %v5075_v21  ;;  %v5392_v41 = vpop.eup %5391 }
 0x295   :  { %5411 = vtanh.f32 %v5076_v31  ;;  %v5394_v42 = vpop.eup %5393  ;;  %v2065_v57 = vadd.f32 1.0, %v5392_v41 }
 0x296   :  { %5413 = vrcp.f32 %v2062_v38  ;;  %v5396_v43 = vpop.eup %5395 }
 0x297   :  { %5415 = vrcp.f32 %v2058_v35  ;;  %v2064_v17 = vadd.f32 1.0, %v5396_v43 }
 0x298   :  { %v5398_v45 = vpop.eup %5397  ;;  %5417 = vtanh.f32 %v5077_v40 }
 0x299   :  { %v5400_v46 = vpop.eup %5399  ;;  %5419 = vrcp.f32 %v2065_v57  ;;  %v2067_v33 = vadd.f32 1.0, %v5398_v45 }
 0x29a   :  { %v5402_v51 = vpop.eup %5401  ;;  %v2097_v54 = vmul.f32 %v5400_v46, %v6527_v39 }
 0x29b   :  { %v5404_v48 = vpop.eup %5403  ;;  %v2096_v59 = vmul.f32 %v5402_v51, %v6530_v49 }
 0x29c   :  { %v5406_v56 = vpop.eup %5405 }
 0x29d   :  { %v5408_v58 = vpop.eup %5407  ;;  %v2101_v60 = vmul.f32 %v5406_v56, %v5386_v25  ;;  %v2066_v25 = vadd.f32 1.0, %v5404_v48 }
 0x29e   :  { %v5410_v28 = vpop.eup %5409  ;;  %v2099_v30 = vmul.f32 %v5408_v58, %v6532_v52 }
 0x29f   :  { %v5412_v18 = vpop.eup %5411  ;;  %v6590_v21 = vadd.f32 %v2101_v60, %v2097_v54  ;;  %v2100_v23 = vmul.f32 %v5410_v28, %v5390_v36 }
 0x2a0   :  { %v5414_v24 = vpop.eup %5413  ;;  %v2103_v31 = vmul.f32 %v5412_v18, %v5394_v42 }
 0x2a1   :  { %v5416_v32 = vpop.eup %5415  ;;  %v2098_v39 = vmul.f32 %v5414_v24, %v6536_v55  ;;  %5421 = vtanh.f32 %v6590_v21  ;;  %v6594_v35 = vadd.f32 %v2100_v23, %v2096_v59 }
 0x2a2   :  { %v5418_v49 = vpop.eup %5417  ;;  %5423 = vrcp.f32 %v2064_v17  ;;  %v6596_v52 = vadd.f32 %v2103_v31, %v2099_v30 }
 0x2a3   :  { %5425 = vtanh.f32 %v6594_v35  ;;  %v2102_v38 = vmul.f32 %v5418_v49, %v5416_v32  ;;  %v5420_v55 = vpop.eup %5419 }
 0x2a4   :  { %5427 = vtanh.f32 %v6596_v52 }
 0x2a5   :  { %5429 = vrcp.f32 %v2067_v33  ;;  %v6600_v36 = vadd.f32 %v2102_v38, %v2098_v39 }
 0x2a6   :  { %5431 = vrcp.f32 %v2066_v25 }
 0x2a7   :  { %5433 = vtanh.f32 %v6600_v36 }
 0x2ab   :  { %v5422_v40 = vpop.eup %5421 }
 0x2ac   :  { %v5424_v41 = vpop.eup %5423  ;;  %v2113_v42 = vmul.f32 %v5422_v40, %v5420_v55 }
 0x2ad   :  { %v5426_v43 = vpop.eup %5425 }
 0x2ae   :  { %v5428_v45 = vpop.eup %5427  ;;  %v2112_v46 = vmul.f32 %v5426_v43, %v5424_v41 }
 0x2af   :  { %v5430_v51 = vpop.eup %5429 }
 0x2b0   :  { %v5432_v48 = vpop.eup %5431  ;;  %v4998_v54 = vpack.c.bf16 %v2113_v42, %v2112_v46  ;;  %v2115_v56 = vmul.f32 %v5430_v51, %v5428_v45 }
 0x2b1   :  { %v5434_v57 = vpop.eup %5433 }
 0x2b2   :  { %4999 = vmatprep.subr.bf16.mxu0 %v4998_v54  ;;  %v2114_v58 = vmul.f32 %v5434_v57, %v5432_v48 }
 0x2b3   :  { %5001 = vmatpush3.bf16.msra.mxu0 %v4998_v54 }
 0x2b4   :  { %v5002_v59 = vpack.c.bf16 %v2115_v56, %v2114_v58 }
 0x2b6   :  { %5003 = vmatprep.subr.bf16.mxu0 %v5002_v59 }
 0x2b7   :  { %5005 = vmatpush3.bf16.msra.mxu0 %v5002_v59 }
 0x2ba   :  { %4775 = vmatmul.mubr.msk.f32.vlgmr.msra.gmra.mrb[16].mxu0 %vm1537_vm1, %v6325_v62 }
 0x2bb   :  { %4777 = vmatprep.mubr.msk.f32.mxu0 %vm1537_vm1, %v6330_v63 }
 0x2be   :  { %4778 = vmatmul.mubr.msk.f32.gmra.mrb[18].mxu0 %vm1537_vm1, %v6343_v0 }
 0x2bf   :  { %4780 = vmatprep.mubr.msk.f32.mxu0 %vm1537_vm1, %v6348_v1 }
 0x2c2   :  { %4781 = vmatmul.mubr.msk.f32.gmra.mrb[20].mxu0 %vm1537_vm1, %v6361_v2 }
 0x2c3   :  { %4783 = vmatprep.mubr.msk.f32.mxu0 %vm1537_vm1, %v6366_v4 }
 0x2c6   :  { %4784 = vmatmul.mubr.msk.f32.gmra.mrb[22].mxu0 %vm1537_vm1, %v6379_v7 }
 0x2c7   :  { %4786 = vmatprep.mubr.msk.f32.mxu0 %vm1537_vm1, %v6384_v8 }
 0x2ca   :  { %4787 = vmatmul.mubr.msk.f32.gmra.mrb[24].mxu0 %vm1537_vm1, %v6393_v3 }
 0x2cb   :  { %4789 = vmatprep.mubr.msk.f32.mxu0 %vm1537_vm1, %v6398_v9 }
 0x2ce   :  { %4790 = vmatmul.mubr.msk.f32.gmra.mrb[26].mxu0 %vm1537_vm1, %v6407_v10 }
 0x2cf   :  { %4792 = vmatprep.mubr.msk.f32.mxu0 %vm1537_vm1, %v6412_v11 }
 0x2d2   :  { %4793 = vmatmul.mubr.msk.f32.gmra.mrb[28].mxu0 %vm1537_vm1, %v6421_v13 }
 0x2d3   :  { %4795 = vmatprep.mubr.msk.f32.mxu0 %vm1537_vm1, %v6426_v26 }
 0x2d6   :  { %4796 = vmatmul.mubr.msk.f32.gmra.mrb[30].mxu0 %vm1537_vm1, %v6435_v27 }
 0x2d7   :  { %4838 = vmatprep.mubr.msk.f32.mxu0 %vm1537_vm1, %v6312_v61 }
 0x38d   :  { %v4776_v62 = vpop.f32.mrb[16].mxu0 }
 0x38e   :  { %v5078_v63 = vadd.f32 %v4776_v62, %v6485_v14  ;;  %v2198_v0 = vpop.f32.mrb[17].mxu0 }
 0x38f   :  { %v5079_v1 = vadd.f32 %v2198_v0, %v6481_v6 }
 0x390   :  { %v4032_v2 = vmul.f32 -1.442695, %v5078_v63 }
 0x391   :  { %v4031_v4 = vmul.f32 -1.442695, %v5079_v1  ;;  %v4779_v7 = vpop.f32.mrb[18].mxu0 }
 0x392   :  { %5435 = vpow2.f32 %v4032_v2  ;;  %v5080_v8 = vadd.f32 %v4779_v7, %v6487_v15  ;;  %v2208_v3 = vpop.f32.mrb[19].mxu0 }
 0x393   :  { %5437 = vpow2.f32 %v4031_v4  ;;  %v5081_v10 = vadd.f32 %v2208_v3, %v6489_v16 }
 0x394   :  { %v4034_v9 = vmul.f32 -1.442695, %v5080_v8 }
 0x395   :  { %v4782_v11 = vpop.f32.mrb[20].mxu0  ;;  %v4033_v60 = vmul.f32 -1.442695, %v5081_v10 }
 0x396   :  { %5439 = vpow2.f32 %v4034_v9  ;;  %v5082_v61 = vadd.f32 %v4782_v11, %v6483_v12  ;;  %v2218_v13 = vpop.f32.mrb[21].mxu0 }
 0x397   :  { %v5083_v26 = vadd.f32 %v2218_v13, %v6479_v5 }
 0x398   :  { %v4036_v27 = vmul.f32 -1.442695, %v5082_v61 }
 0x399   :  { %v4035_v28 = vmul.f32 -1.442695, %v5083_v26  ;;  %v4785_v30 = vpop.f32.mrb[22].mxu0 }
 0x39a   :  { %5441 = vpow2.f32 %v4036_v27  ;;  %v5084_v17 = vadd.f32 %v4785_v30, %v6492_v20  ;;  %v2228_v18 = vpop.f32.mrb[23].mxu0 }
 0x39b   :  { %5443 = vpow2.f32 %v4035_v28  ;;  %v5085_v23 = vadd.f32 %v2228_v18, %v6495_v22 }
 0x39c   :  { %v5436_v24 = vpop.eup %5435  ;;  %v4038_v31 = vmul.f32 -1.442695, %v5084_v17  ;;  %5445 = vpow2.f32 %v4033_v60 }
 0x39d   :  { %v5438_v32 = vpop.eup %5437  ;;  %v2330_v39 = vadd.f32 1.0, %v5436_v24  ;;  %v4037_v33 = vmul.f32 -1.442695, %v5085_v23  ;;  %v4788_v49 = vpop.f32.mrb[24].mxu0 }
 0x39e   :  { %v2329_v25 = vadd.f32 1.0, %v5438_v32  ;;  %5447 = vpow2.f32 %v4038_v31  ;;  %v5086_v38 = vadd.f32 %v4788_v49, %v6498_v34  ;;  %v2238_v55 = vpop.f32.mrb[25].mxu0 }
 0x39f   :  { %v5087_v40 = vadd.f32 %v2238_v55, %v6501_v37  ;;  %5449 = vrcp.f32 %v2330_v39 }
 0x3a0   :  { %v5440_v41 = vpop.eup %5439  ;;  %v4040_v42 = vmul.f32 -1.442695, %v5086_v38  ;;  %5451 = vpow2.f32 %v4037_v33 }
 0x3a1   :  { %v2332_v43 = vadd.f32 1.0, %v5440_v41  ;;  %v4039_v45 = vmul.f32 -1.442695, %v5087_v40  ;;  %v4791_v46 = vpop.f32.mrb[26].mxu0  ;;  %5453 = vrcp.f32 %v2329_v25 }
 0x3a2   :  { %v5088_v51 = vadd.f32 %v4791_v46, %v6513_v29  ;;  %v2248_v48 = vpop.f32.mrb[27].mxu0  ;;  %5455 = vpow2.f32 %v4040_v42 }
 0x3a3   :  { %v5089_v54 = vadd.f32 %v2248_v48, %v6515_v19  ;;  %5457 = vrcp.f32 %v2332_v43 }
 0x3a4   :  { %v5442_v56 = vpop.eup %5441  ;;  %v4042_v57 = vmul.f32 -1.442695, %v5088_v51  ;;  %5459 = vpow2.f32 %v4039_v45 }
 0x3a5   :  { %v5444_v58 = vpop.eup %5443  ;;  %v2334_v59 = vadd.f32 1.0, %v5442_v56  ;;  %v4041_v62 = vmul.f32 -1.442695, %v5089_v54  ;;  %v4794_v63 = vpop.f32.mrb[28].mxu0 }
 0x3a6   :  { %v2333_v0 = vadd.f32 1.0, %v5444_v58  ;;  %5461 = vpow2.f32 %v4042_v57  ;;  %v5090_v1 = vadd.f32 %v4794_v63, %v6506_v47  ;;  %v2258_v2 = vpop.f32.mrb[29].mxu0  ;;  %v5446_v4 = vpop.eup %5445 }
 0x3a7   :  { %5463 = vrcp.f32 %v2334_v59  ;;  %v5091_v8 = vadd.f32 %v2258_v2, %v6509_v50  ;;  %v2331_v26 = vadd.f32 1.0, %v5446_v4 }
 0x3a8   :  { %v5448_v7 = vpop.eup %5447  ;;  %5465 = vrcp.f32 %v2333_v0 }
 0x3a9   :  { %v2336_v3 = vadd.f32 1.0, %v5448_v7  ;;  %5467 = vpow2.f32 %v4041_v62  ;;  %v4797_v9 = vpop.f32.mrb[30].mxu0  ;;  %v5450_v10 = vpop.eup %5449 }
 0x3aa   :  { %5469 = vtanh.f32 %v5090_v1  ;;  %v5092_v11 = vadd.f32 %v4797_v9, %v6521_v44  ;;  %v2268_v61 = vpop.f32.mrb[31].mxu0  ;;  %v5452_v13 = vpop.eup %5451 }
 0x3ab   :  { %5471 = vrcp.f32 %v2336_v3  ;;  %v5454_v27 = vpop.eup %5453  ;;  %v2335_v60 = vadd.f32 1.0, %v5452_v13  ;;  %v5093_v28 = vadd.f32 %v2268_v61, %v6524_v53 }
 0x3ac   :  { %5473 = vtanh.f32 %v5091_v8  ;;  %v5456_v30 = vpop.eup %5455 }
 0x3ad   :  { %5475 = vtanh.f32 %v5092_v11  ;;  %v5458_v17 = vpop.eup %5457  ;;  %v2338_v49 = vadd.f32 1.0, %v5456_v30  ;;  %v6698_v30 = vld [vmem:[%s7095_s2 + $0x28] sm:$0xff] }
 0x3ae   :  { %5477 = vrcp.f32 %v2335_v60  ;;  %v5460_v18 = vpop.eup %5459  ;;  %v6684_v60 = vld [vmem:[%s7095_s2 + $0x18] sm:$0xff] }
 0x3af   :  { %5479 = vrcp.f32 %v2331_v26  ;;  %v2337_v42 = vadd.f32 1.0, %v5460_v18  ;;  %v6670_v26 = vld [vmem:[%s7095_s2 + $0x8] sm:$0xff]  ;;  %v6712_v18 = vld [vmem:[%s7095_s2 + $0x38] sm:$0xff] }
 0x3b0   :  { %v5462_v23 = vpop.eup %5461  ;;  %5481 = vtanh.f32 %v5093_v28  ;;  %v6691_v28 = vld [vmem:[%s7095_s2 + $0x20] sm:$0xff] }
 0x3b1   :  { %v5464_v24 = vpop.eup %5463  ;;  %5483 = vrcp.f32 %v2338_v49  ;;  %v2340_v56 = vadd.f32 1.0, %v5462_v23  ;;  %v6719_v23 = vld [vmem:[%s7095_s2 + $0x40] sm:$0xff]  ;;  %v6761_v49 = vld [vmem:[%s7095_s2 + $0x70] sm:$0xff] }
 0x3b2   :  { %v5466_v31 = vpop.eup %5465  ;;  %v2370_v39 = vmul.f32 %v5464_v24, %v6590_v21  ;;  %v6726_v24 = vld [vmem:[%s7095_s2 + $0x48] sm:$0xff] }
 0x3b3   :  { %v5468_v32 = vpop.eup %5467  ;;  %v2369_v38 = vmul.f32 %v5466_v31, %v6594_v35  ;;  %v6733_v31 = vld [vmem:[%s7095_s2 + $0x50] sm:$0xff] }
 0x3b4   :  { %v5470_v33 = vpop.eup %5469  ;;  %v2339_v58 = vadd.f32 1.0, %v5468_v32  ;;  %v6740_v32 = vld [vmem:[%s7095_s2 + $0x58] sm:$0xff] }
 0x3b5   :  { %v5472_v25 = vpop.eup %5471  ;;  %v2374_v55 = vmul.f32 %v5470_v33, %v5450_v10  ;;  %v6754_v33 = vld [vmem:[%s7095_s2 + $0x68] sm:$0xff] }
 0x3b6   :  { %v5474_v40 = vpop.eup %5473  ;;  %v2372_v41 = vmul.f32 %v5472_v25, %v6596_v52  ;;  %v6768_v25 = vld [vmem:[%s7095_s2 + $0x78] sm:$0xff] }
 0x3b7   :  { %v5476_v43 = vpop.eup %5475  ;;  %v6654_v45 = vadd.f32 %v2374_v55, %v2370_v39  ;;  %v2373_v46 = vmul.f32 %v5474_v40, %v5454_v27  ;;  %v6677_v27 = vld [vmem:[%s7095_s2 + $0x10] sm:$0xff]  ;;  %v6747_v39 = vld [vmem:[%s7095_s2 + $0x60] sm:$0xff] }
 0x3b8   :  { %v5478_v51 = vpop.eup %5477  ;;  %v2376_v48 = vmul.f32 %v5476_v43, %v5458_v17  ;;  %v6705_v17 = vld [vmem:[%s7095_s2 + $0x30] sm:$0xff] }
 0x3b9   :  { %v5480_v54 = vpop.eup %5479  ;;  %v2371_v21 = vmul.f32 %v5478_v51, %v6600_v36  ;;  %5485 = vtanh.f32 %v6654_v45  ;;  %v6658_v57 = vadd.f32 %v2373_v46, %v2369_v38  ;;  %v6775_v38 = vld [vmem:[%s7095_s2] sm:$0xff] }
 0x3ba   :  { %v5482_v35 = vpop.eup %5481  ;;  %5487 = vrcp.f32 %v2337_v42  ;;  %v6660_v52 = vadd.f32 %v2376_v48, %v2372_v41 }
 0x3bb   :  { %5489 = vtanh.f32 %v6658_v57  ;;  %v2375_v59 = vmul.f32 %v5482_v35, %v5480_v54  ;;  %v5484_v36 = vpop.eup %5483 }
 0x3bc   :  { %5491 = vtanh.f32 %v6660_v52 }
 0x3bd   :  { %5493 = vrcp.f32 %v2340_v56  ;;  %v6664_v62 = vadd.f32 %v2375_v59, %v2371_v21 }
 0x3be   :  { %5495 = vrcp.f32 %v2339_v58 }
 0x3bf   :  { %5497 = vtanh.f32 %v6664_v62 }
 0x3c3   :  { %v5486_v63 = vpop.eup %5485 }
 0x3c4   :  { %v5488_v0 = vpop.eup %5487  ;;  %v2386_v1 = vmul.f32 %v5486_v63, %v5484_v36 }
 0x3c5   :  { %v5490_v2 = vpop.eup %5489 }
 0x3c6   :  { %v5492_v4 = vpop.eup %5491  ;;  %v2385_v7 = vmul.f32 %v5490_v2, %v5488_v0 }
 0x3c7   :  { %v5494_v8 = vpop.eup %5493 }
 0x3c8   :  { %v5496_v3 = vpop.eup %5495  ;;  %v5006_v9 = vpack.c.bf16 %v2386_v1, %v2385_v7  ;;  %v2388_v10 = vmul.f32 %v5494_v8, %v5492_v4 }
 0x3c9   :  { %v5498_v11 = vpop.eup %5497 }
 0x3ca   :  { %5007 = vmatprep.subr.bf16.mxu1 %v5006_v9  ;;  %v2387_v61 = vmul.f32 %v5498_v11, %v5496_v3 }
 0x3cb   :  { %5009 = vmatpush3.bf16.msra.mxu1 %v5006_v9 }
 0x3cc   :  { %v5010_v13 = vpack.c.bf16 %v2388_v10, %v2387_v61 }
 0x3ce   :  { %5011 = vmatprep.subr.bf16.mxu1 %v5010_v13 }
 0x3cf   :  { %5013 = vmatpush3.bf16.msra.mxu1 %v5010_v13 }
 0x3d2   :  { %4807 = vmatmul.mubr.msk.f32.vlgmr.msra.gmra.mrb[16].mxu1 %vm1537_vm1, %v6670_v26 }
 0x3d3   :  { %4809 = vmatprep.mubr.msk.f32.mxu1 %vm1537_vm1, %v6677_v27 }
 0x3d6   :  { %4810 = vmatmul.mubr.msk.f32.gmra.mrb[18].mxu1 %vm1537_vm1, %v6684_v60 }
 0x3d7   :  { %4812 = vmatprep.mubr.msk.f32.mxu1 %vm1537_vm1, %v6691_v28 }
 0x3da   :  { %4813 = vmatmul.mubr.msk.f32.gmra.mrb[20].mxu1 %vm1537_vm1, %v6698_v30 }
 0x3db   :  { %4815 = vmatprep.mubr.msk.f32.mxu1 %vm1537_vm1, %v6705_v17 }
 0x3de   :  { %4816 = vmatmul.mubr.msk.f32.gmra.mrb[22].mxu1 %vm1537_vm1, %v6712_v18 }
 0x3df   :  { %4818 = vmatprep.mubr.msk.f32.mxu1 %vm1537_vm1, %v6719_v23 }
 0x3e2   :  { %4819 = vmatmul.mubr.msk.f32.gmra.mrb[24].mxu1 %vm1537_vm1, %v6726_v24 }
 0x3e3   :  { %4821 = vmatprep.mubr.msk.f32.mxu1 %vm1537_vm1, %v6733_v31 }
 0x3e6   :  { %4822 = vmatmul.mubr.msk.f32.gmra.mrb[26].mxu1 %vm1537_vm1, %v6740_v32 }
 0x3e7   :  { %4824 = vmatprep.mubr.msk.f32.mxu1 %vm1537_vm1, %v6747_v39 }
 0x3ea   :  { %4825 = vmatmul.mubr.msk.f32.gmra.mrb[28].mxu1 %vm1537_vm1, %v6754_v33 }
 0x3eb   :  { %4827 = vmatprep.mubr.msk.f32.mxu1 %vm1537_vm1, %v6761_v49 }
 0x3ee   :  { %4828 = vmatmul.mubr.msk.f32.gmra.mrb[30].mxu1 %vm1537_vm1, %v6768_v25 }
 0x3ef   :  { %4870 = vmatprep.mubr.msk.f32.mxu1 %vm1537_vm1, %v6775_v38 }
 0x4a5   :  { %v4808_v55 = vpop.f32.mrb[16].mxu1 }
 0x4a6   :  { %v5094_v40 = vadd.f32 %v4808_v55, %v6485_v14  ;;  %v2471_v41 = vpop.f32.mrb[17].mxu1 }
 0x4a7   :  { %v5095_v42 = vadd.f32 %v2471_v41, %v6481_v6 }
 0x4a8   :  { %v4060_v43 = vmul.f32 -1.442695, %v5094_v40 }
 0x4a9   :  { %v4059_v46 = vmul.f32 -1.442695, %v5095_v42  ;;  %v4811_v51 = vpop.f32.mrb[18].mxu1 }
 0x4aa   :  { %5499 = vpow2.f32 %v4060_v43  ;;  %v5096_v48 = vadd.f32 %v4811_v51, %v6487_v15  ;;  %v2481_v54 = vpop.f32.mrb[19].mxu1 }
 0x4ab   :  { %5501 = vpow2.f32 %v4059_v46  ;;  %v5097_v56 = vadd.f32 %v2481_v54, %v6489_v16 }
 0x4ac   :  { %v4062_v21 = vmul.f32 -1.442695, %v5096_v48 }
 0x4ad   :  { %v4814_v35 = vpop.f32.mrb[20].mxu1  ;;  %v4061_v0 = vmul.f32 -1.442695, %v5097_v56 }
 0x4ae   :  { %5503 = vpow2.f32 %v4062_v21  ;;  %v5098_v58 = vadd.f32 %v4814_v35, %v6483_v12  ;;  %v2491_v59 = vpop.f32.mrb[21].mxu1 }
 0x4af   :  { %v5099_v36 = vadd.f32 %v2491_v59, %v6479_v5 }
 0x4b0   :  { %v4064_v63 = vmul.f32 -1.442695, %v5098_v58 }
 0x4b1   :  { %v4063_v1 = vmul.f32 -1.442695, %v5099_v36  ;;  %v4817_v2 = vpop.f32.mrb[22].mxu1 }
 0x4b2   :  { %5505 = vpow2.f32 %v4064_v63  ;;  %v5100_v4 = vadd.f32 %v4817_v2, %v6492_v20  ;;  %v2501_v7 = vpop.f32.mrb[23].mxu1 }
 0x4b3   :  { %5507 = vpow2.f32 %v4063_v1  ;;  %v5101_v8 = vadd.f32 %v2501_v7, %v6495_v22 }
 0x4b4   :  { %v5500_v3 = vpop.eup %5499  ;;  %v4066_v9 = vmul.f32 -1.442695, %v5100_v4  ;;  %5509 = vpow2.f32 %v4061_v0 }
 0x4b5   :  { %v5502_v10 = vpop.eup %5501  ;;  %v2603_v11 = vadd.f32 1.0, %v5500_v3  ;;  %v4065_v61 = vmul.f32 -1.442695, %v5101_v8  ;;  %v4820_v13 = vpop.f32.mrb[24].mxu1 }
 0x4b6   :  { %v2602_v55 = vadd.f32 1.0, %v5502_v10  ;;  %5511 = vpow2.f32 %v4066_v9  ;;  %v5102_v40 = vadd.f32 %v4820_v13, %v6498_v34  ;;  %v2511_v41 = vpop.f32.mrb[25].mxu1 }
 0x4b7   :  { %v5103_v42 = vadd.f32 %v2511_v41, %v6501_v37  ;;  %5513 = vrcp.f32 %v2603_v11 }
 0x4b8   :  { %v5504_v43 = vpop.eup %5503  ;;  %v4068_v46 = vmul.f32 -1.442695, %v5102_v40  ;;  %5515 = vpow2.f32 %v4065_v61 }
 0x4b9   :  { %v2605_v51 = vadd.f32 1.0, %v5504_v43  ;;  %v4067_v48 = vmul.f32 -1.442695, %v5103_v42  ;;  %v4823_v54 = vpop.f32.mrb[26].mxu1  ;;  %5517 = vrcp.f32 %v2602_v55 }
 0x4ba   :  { %v5104_v21 = vadd.f32 %v4823_v54, %v6513_v29  ;;  %v2521_v56 = vpop.f32.mrb[27].mxu1  ;;  %5519 = vpow2.f32 %v4068_v46 }
 0x4bb   :  { %v5105_v35 = vadd.f32 %v2521_v56, %v6515_v19  ;;  %5521 = vrcp.f32 %v2605_v51 }
 0x4bc   :  { %v5506_v58 = vpop.eup %5505  ;;  %v4070_v59 = vmul.f32 -1.442695, %v5104_v21  ;;  %5523 = vpow2.f32 %v4067_v48 }
 0x4bd   :  { %v5508_v36 = vpop.eup %5507  ;;  %v2607_v63 = vadd.f32 1.0, %v5506_v58  ;;  %v4069_v0 = vmul.f32 -1.442695, %v5105_v35  ;;  %v4826_v1 = vpop.f32.mrb[28].mxu1 }
 0x4be   :  { %v2606_v2 = vadd.f32 1.0, %v5508_v36  ;;  %5525 = vpow2.f32 %v4070_v59  ;;  %v5106_v4 = vadd.f32 %v4826_v1, %v6506_v47  ;;  %v2531_v7 = vpop.f32.mrb[29].mxu1  ;;  %v5510_v8 = vpop.eup %5509 }
 0x4bf   :  { %5527 = vrcp.f32 %v2607_v63  ;;  %v5107_v9 = vadd.f32 %v2531_v7, %v6509_v50  ;;  %v2604_v41 = vadd.f32 1.0, %v5510_v8 }
 0x4c0   :  { %v5512_v3 = vpop.eup %5511  ;;  %5529 = vrcp.f32 %v2606_v2 }
 0x4c1   :  { %v2609_v10 = vadd.f32 1.0, %v5512_v3  ;;  %5531 = vpow2.f32 %v4069_v0  ;;  %v4829_v11 = vpop.f32.mrb[30].mxu1  ;;  %v5514_v61 = vpop.eup %5513 }
 0x4c2   :  { %5533 = vtanh.f32 %v5106_v4  ;;  %v5108_v13 = vadd.f32 %v4829_v11, %v6521_v44  ;;  %v2541_v55 = vpop.f32.mrb[31].mxu1  ;;  %v5516_v40 = vpop.eup %5515 }
 0x4c3   :  { %5535 = vrcp.f32 %v2609_v10  ;;  %v5518_v42 = vpop.eup %5517  ;;  %v2608_v43 = vadd.f32 1.0, %v5516_v40  ;;  %v5109_v46 = vadd.f32 %v2541_v55, %v6524_v53 }
 0x4c4   :  { %5537 = vtanh.f32 %v5107_v9  ;;  %v5520_v51 = vpop.eup %5519 }
 0x4c5   :  { %5539 = vtanh.f32 %v5108_v13  ;;  %v5522_v48 = vpop.eup %5521  ;;  %v2611_v63 = vadd.f32 1.0, %v5520_v51 }
 0x4c6   :  { %5541 = vrcp.f32 %v2608_v43  ;;  %v5524_v54 = vpop.eup %5523 }
 0x4c7   :  { %5543 = vrcp.f32 %v2604_v41  ;;  %v2610_v8 = vadd.f32 1.0, %v5524_v54 }
 0x4c8   :  { %v5526_v21 = vpop.eup %5525  ;;  %5545 = vtanh.f32 %v5109_v46 }
 0x4c9   :  { %v5528_v56 = vpop.eup %5527  ;;  %5547 = vrcp.f32 %v2611_v63  ;;  %v2613_v40 = vadd.f32 1.0, %v5526_v21 }
 0x4ca   :  { %v5530_v35 = vpop.eup %5529  ;;  %v2643_v59 = vmul.f32 %v5528_v56, %v6654_v45 }
 0x4cb   :  { %v5532_v58 = vpop.eup %5531  ;;  %v2642_v1 = vmul.f32 %v5530_v35, %v6658_v57 }
 0x4cc   :  { %v5534_v36 = vpop.eup %5533 }
 0x4cd   :  { %v5536_v0 = vpop.eup %5535  ;;  %v2647_v2 = vmul.f32 %v5534_v36, %v5514_v61  ;;  %v2612_v61 = vadd.f32 1.0, %v5532_v58 }
 0x4ce   :  { %v5538_v4 = vpop.eup %5537  ;;  %v2645_v7 = vmul.f32 %v5536_v0, %v6660_v52 }
 0x4cf   :  { %v5540_v3 = vpop.eup %5539  ;;  %v6798_v9 = vadd.f32 %v2647_v2, %v2643_v59  ;;  %v2646_v10 = vmul.f32 %v5538_v4, %v5518_v42 }
 0x4d0   :  { %v5542_v11 = vpop.eup %5541  ;;  %v2649_v13 = vmul.f32 %v5540_v3, %v5522_v48 }
 0x4d1   :  { %v5544_v55 = vpop.eup %5543  ;;  %v2644_v45 = vmul.f32 %v5542_v11, %v6664_v62  ;;  %5549 = vtanh.f32 %v6798_v9  ;;  %v6802_v41 = vadd.f32 %v2646_v10, %v2642_v1 }
 0x4d2   :  { %v5546_v57 = vpop.eup %5545  ;;  %5551 = vrcp.f32 %v2610_v8  ;;  %v6804_v52 = vadd.f32 %v2649_v13, %v2645_v7 }
 0x4d3   :  { %5553 = vtanh.f32 %v6802_v41  ;;  %v2648_v43 = vmul.f32 %v5546_v57, %v5544_v55  ;;  %v5548_v62 = vpop.eup %5547 }
 0x4d4   :  { %5555 = vtanh.f32 %v6804_v52 }
 0x4d5   :  { %5557 = vrcp.f32 %v2613_v40  ;;  %v6808_v42 = vadd.f32 %v2648_v43, %v2644_v45 }
 0x4d6   :  { %5559 = vrcp.f32 %v2612_v61 }
 0x4d7   :  { %5561 = vtanh.f32 %v6808_v42 }
 0x4db   :  { %v5550_v46 = vpop.eup %5549 }
 0x4dc   :  { %v5552_v51 = vpop.eup %5551  ;;  %v2659_v48 = vmul.f32 %v5550_v46, %v5548_v62 }
 0x4dd   :  { %v5554_v54 = vpop.eup %5553 }
 0x4de   :  { %v5556_v21 = vpop.eup %5555  ;;  %v2658_v56 = vmul.f32 %v5554_v54, %v5552_v51 }
 0x4df   :  { %v5558_v35 = vpop.eup %5557 }
 0x4e0   :  { %v5560_v58 = vpop.eup %5559  ;;  %v5014_v59 = vpack.c.bf16 %v2659_v48, %v2658_v56  ;;  %v2661_v36 = vmul.f32 %v5558_v35, %v5556_v21 }
 0x4e1   :  { %v5562_v63 = vpop.eup %5561 }
 0x4e2   :  { %5015 = vmatprep.subr.bf16.mxu0 %v5014_v59  ;;  %v2660_v0 = vmul.f32 %v5562_v63, %v5560_v58 }
 0x4e3   :  { %5017 = vmatpush3.bf16.msra.mxu0 %v5014_v59 }
 0x4e4   :  { %v5018_v1 = vpack.c.bf16 %v2661_v36, %v2660_v0 }
 0x4e6   :  { %5019 = vmatprep.subr.bf16.mxu0 %v5018_v1 }
 0x4e7   :  { %5021 = vmatpush3.bf16.msra.mxu0 %v5018_v1 }
 0x4ea   :  { %4839 = vmatmul.mubr.msk.f32.vlgmr.msra.gmra.mrb[32].mxu0 %vm1537_vm1, %v6670_v26 }
 0x4eb   :  { %4841 = vmatprep.mubr.msk.f32.mxu0 %vm1537_vm1, %v6677_v27 }
 0x4ee   :  { %4842 = vmatmul.mubr.msk.f32.gmra.mrb[34].mxu0 %vm1537_vm1, %v6684_v60 }
 0x4ef   :  { %4844 = vmatprep.mubr.msk.f32.mxu0 %vm1537_vm1, %v6691_v28 }
 0x4f2   :  { %4845 = vmatmul.mubr.msk.f32.gmra.mrb[36].mxu0 %vm1537_vm1, %v6698_v30 }
 0x4f3   :  { %4847 = vmatprep.mubr.msk.f32.mxu0 %vm1537_vm1, %v6705_v17 }
 0x4f6   :  { %4848 = vmatmul.mubr.msk.f32.gmra.mrb[38].mxu0 %vm1537_vm1, %v6712_v18 }
 0x4f7   :  { %4850 = vmatprep.mubr.msk.f32.mxu0 %vm1537_vm1, %v6719_v23 }
 0x4fa   :  { %4851 = vmatmul.mubr.msk.f32.gmra.mrb[40].mxu0 %vm1537_vm1, %v6726_v24 }
 0x4fb   :  { %4853 = vmatprep.mubr.msk.f32.mxu0 %vm1537_vm1, %v6733_v31 }
 0x4fe   :  { %4854 = vmatmul.mubr.msk.f32.gmra.mrb[42].mxu0 %vm1537_vm1, %v6740_v32 }
 0x4ff   :  { %4856 = vmatprep.mubr.msk.f32.mxu0 %vm1537_vm1, %v6747_v39 }
 0x502   :  { %4857 = vmatmul.mubr.msk.f32.gmra.mrb[44].mxu0 %vm1537_vm1, %v6754_v33 }
 0x503   :  { %4859 = vmatprep.mubr.msk.f32.mxu0 %vm1537_vm1, %v6761_v49 }
 0x506   :  { %4860 = vmatmul.mubr.msk.f32.gmra.mrb[46].mxu0 %vm1537_vm1, %v6768_v25 }
 0x507   :  { %4902 = vmatprep.mubr.msk.f32.mxu0 %vm1537_vm1, %v6775_v38 }
 0x5bd   :  { %v4840_v2 = vpop.f32.mrb[32].mxu0 }
 0x5be   :  { %v5110_v4 = vadd.f32 %v4840_v2, %v6485_v14  ;;  %v2744_v7 = vpop.f32.mrb[33].mxu0 }
 0x5bf   :  { %v5111_v8 = vadd.f32 %v2744_v7, %v6481_v6 }
 0x5c0   :  { %v4088_v3 = vmul.f32 -1.442695, %v5110_v4 }
 0x5c1   :  { %v4087_v10 = vmul.f32 -1.442695, %v5111_v8  ;;  %v4843_v11 = vpop.f32.mrb[34].mxu0 }
 0x5c2   :  { %5563 = vpow2.f32 %v4088_v3  ;;  %v5112_v13 = vadd.f32 %v4843_v11, %v6487_v15  ;;  %v2754_v55 = vpop.f32.mrb[35].mxu0 }
 0x5c3   :  { %5565 = vpow2.f32 %v4087_v10  ;;  %v5113_v40 = vadd.f32 %v2754_v55, %v6489_v16 }
 0x5c4   :  { %v4090_v45 = vmul.f32 -1.442695, %v5112_v13 }
 0x5c5   :  { %v4846_v57 = vpop.f32.mrb[36].mxu0  ;;  %v4089_v51 = vmul.f32 -1.442695, %v5113_v40 }
 0x5c6   :  { %5567 = vpow2.f32 %v4090_v45  ;;  %v5114_v61 = vadd.f32 %v4846_v57, %v6483_v12  ;;  %v2764_v43 = vpop.f32.mrb[37].mxu0 }
 0x5c7   :  { %v5115_v62 = vadd.f32 %v2764_v43, %v6479_v5 }
 0x5c8   :  { %v4092_v46 = vmul.f32 -1.442695, %v5114_v61 }
 0x5c9   :  { %v4091_v48 = vmul.f32 -1.442695, %v5115_v62  ;;  %v4849_v54 = vpop.f32.mrb[38].mxu0 }
 0x5ca   :  { %5569 = vpow2.f32 %v4092_v46  ;;  %v5116_v21 = vadd.f32 %v4849_v54, %v6492_v20  ;;  %v2774_v56 = vpop.f32.mrb[39].mxu0 }
 0x5cb   :  { %5571 = vpow2.f32 %v4091_v48  ;;  %v5117_v35 = vadd.f32 %v2774_v56, %v6495_v22 }
 0x5cc   :  { %v5564_v58 = vpop.eup %5563  ;;  %v4094_v59 = vmul.f32 -1.442695, %v5116_v21  ;;  %5573 = vpow2.f32 %v4089_v51 }
 0x5cd   :  { %v5566_v36 = vpop.eup %5565  ;;  %v2876_v63 = vadd.f32 1.0, %v5564_v58  ;;  %v4093_v0 = vmul.f32 -1.442695, %v5117_v35  ;;  %v4852_v1 = vpop.f32.mrb[40].mxu0 }
 0x5ce   :  { %v2875_v2 = vadd.f32 1.0, %v5566_v36  ;;  %5575 = vpow2.f32 %v4094_v59  ;;  %v5118_v4 = vadd.f32 %v4852_v1, %v6498_v34  ;;  %v2784_v7 = vpop.f32.mrb[41].mxu0 }
 0x5cf   :  { %v5119_v8 = vadd.f32 %v2784_v7, %v6501_v37  ;;  %5577 = vrcp.f32 %v2876_v63 }
 0x5d0   :  { %v5568_v3 = vpop.eup %5567  ;;  %v4096_v10 = vmul.f32 -1.442695, %v5118_v4  ;;  %5579 = vpow2.f32 %v4093_v0 }
 0x5d1   :  { %v2878_v11 = vadd.f32 1.0, %v5568_v3  ;;  %v4095_v13 = vmul.f32 -1.442695, %v5119_v8  ;;  %v4855_v55 = vpop.f32.mrb[42].mxu0  ;;  %5581 = vrcp.f32 %v2875_v2 }
 0x5d2   :  { %v5120_v45 = vadd.f32 %v4855_v55, %v6513_v29  ;;  %v2794_v40 = vpop.f32.mrb[43].mxu0  ;;  %5583 = vpow2.f32 %v4096_v10 }
 0x5d3   :  { %v5121_v57 = vadd.f32 %v2794_v40, %v6515_v19  ;;  %5585 = vrcp.f32 %v2878_v11 }
 0x5d4   :  { %v5570_v61 = vpop.eup %5569  ;;  %v4098_v43 = vmul.f32 -1.442695, %v5120_v45  ;;  %5587 = vpow2.f32 %v4095_v13 }
 0x5d5   :  { %v5572_v62 = vpop.eup %5571  ;;  %v2880_v46 = vadd.f32 1.0, %v5570_v61  ;;  %v4097_v51 = vmul.f32 -1.442695, %v5121_v57  ;;  %v4858_v48 = vpop.f32.mrb[44].mxu0 }
 0x5d6   :  { %v2879_v54 = vadd.f32 1.0, %v5572_v62  ;;  %5589 = vpow2.f32 %v4098_v43  ;;  %v5122_v21 = vadd.f32 %v4858_v48, %v6506_v47  ;;  %v2804_v56 = vpop.f32.mrb[45].mxu0  ;;  %v5574_v35 = vpop.eup %5573 }
 0x5d7   :  { %5591 = vrcp.f32 %v2880_v46  ;;  %v5123_v59 = vadd.f32 %v2804_v56, %v6509_v50  ;;  %v2877_v7 = vadd.f32 1.0, %v5574_v35 }
 0x5d8   :  { %v5576_v58 = vpop.eup %5575  ;;  %5593 = vrcp.f32 %v2879_v54 }
 0x5d9   :  { %v2882_v36 = vadd.f32 1.0, %v5576_v58  ;;  %5595 = vpow2.f32 %v4097_v51  ;;  %v4861_v63 = vpop.f32.mrb[46].mxu0  ;;  %v5578_v0 = vpop.eup %5577 }
 0x5da   :  { %5597 = vtanh.f32 %v5122_v21  ;;  %v5124_v1 = vadd.f32 %v4861_v63, %v6521_v44  ;;  %v2814_v2 = vpop.f32.mrb[47].mxu0  ;;  %v5580_v4 = vpop.eup %5579 }
 0x5db   :  { %5599 = vrcp.f32 %v2882_v36  ;;  %v5582_v8 = vpop.eup %5581  ;;  %v2881_v3 = vadd.f32 1.0, %v5580_v4  ;;  %v5125_v10 = vadd.f32 %v2814_v2, %v6524_v53 }
 0x5dc   :  { %5601 = vtanh.f32 %v5123_v59  ;;  %v5584_v11 = vpop.eup %5583 }
 0x5dd   :  { %5603 = vtanh.f32 %v5124_v1  ;;  %v5586_v13 = vpop.eup %5585  ;;  %v2884_v46 = vadd.f32 1.0, %v5584_v11 }
 0x5de   :  { %5605 = vrcp.f32 %v2881_v3  ;;  %v5588_v55 = vpop.eup %5587 }
 0x5df   :  { %5607 = vrcp.f32 %v2877_v7  ;;  %v2883_v35 = vadd.f32 1.0, %v5588_v55 }
 0x5e0   :  { %v5590_v45 = vpop.eup %5589  ;;  %5609 = vtanh.f32 %v5125_v10 }
 0x5e1   :  { %v5592_v40 = vpop.eup %5591  ;;  %5611 = vrcp.f32 %v2884_v46  ;;  %v2886_v4 = vadd.f32 1.0, %v5590_v45 }
 0x5e2   :  { %v5594_v57 = vpop.eup %5593  ;;  %v2916_v43 = vmul.f32 %v5592_v40, %v6798_v9 }
 0x5e3   :  { %v5596_v61 = vpop.eup %5595  ;;  %v2915_v48 = vmul.f32 %v5594_v57, %v6802_v41 }
 0x5e4   :  { %v5598_v62 = vpop.eup %5597 }
 0x5e5   :  { %v5600_v51 = vpop.eup %5599  ;;  %v2920_v54 = vmul.f32 %v5598_v62, %v5578_v0  ;;  %v2885_v0 = vadd.f32 1.0, %v5596_v61 }
 0x5e6   :  { %v5602_v21 = vpop.eup %5601  ;;  %v2918_v56 = vmul.f32 %v5600_v51, %v6804_v52 }
 0x5e7   :  { %v5604_v58 = vpop.eup %5603  ;;  %v6862_v59 = vadd.f32 %v2920_v54, %v2916_v43  ;;  %v2919_v36 = vmul.f32 %v5602_v21, %v5582_v8 }
 0x5e8   :  { %v5606_v63 = vpop.eup %5605  ;;  %v2922_v1 = vmul.f32 %v5604_v58, %v5586_v13 }
 0x5e9   :  { %v5608_v2 = vpop.eup %5607  ;;  %v2917_v9 = vmul.f32 %v5606_v63, %v6808_v42  ;;  %5613 = vtanh.f32 %v6862_v59  ;;  %v6866_v7 = vadd.f32 %v2919_v36, %v2915_v48 }
 0x5ea   :  { %v5610_v41 = vpop.eup %5609  ;;  %5615 = vrcp.f32 %v2883_v35  ;;  %v6868_v52 = vadd.f32 %v2922_v1, %v2918_v56 }
 0x5eb   :  { %5617 = vtanh.f32 %v6866_v7  ;;  %v2921_v3 = vmul.f32 %v5610_v41, %v5608_v2  ;;  %v5612_v42 = vpop.eup %5611 }
 0x5ec   :  { %5619 = vtanh.f32 %v6868_v52 }
 0x5ed   :  { %5621 = vrcp.f32 %v2886_v4  ;;  %v6872_v8 = vadd.f32 %v2921_v3, %v2917_v9 }
 0x5ee   :  { %5623 = vrcp.f32 %v2885_v0 }
 0x5ef   :  { %5625 = vtanh.f32 %v6872_v8 }
 0x5f3   :  { %v5614_v10 = vpop.eup %5613 }
 0x5f4   :  { %v5616_v11 = vpop.eup %5615  ;;  %v2932_v13 = vmul.f32 %v5614_v10, %v5612_v42 }
 0x5f5   :  { %v5618_v55 = vpop.eup %5617 }
 0x5f6   :  { %v5620_v45 = vpop.eup %5619  ;;  %v2931_v40 = vmul.f32 %v5618_v55, %v5616_v11 }
 0x5f7   :  { %v5622_v57 = vpop.eup %5621 }
 0x5f8   :  { %v5624_v61 = vpop.eup %5623  ;;  %v5022_v43 = vpack.c.bf16 %v2932_v13, %v2931_v40  ;;  %v2934_v62 = vmul.f32 %v5622_v57, %v5620_v45 }
 0x5f9   :  { %v5626_v46 = vpop.eup %5625 }
 0x5fa   :  { %5023 = vmatprep.subr.bf16.mxu1 %v5022_v43  ;;  %v2933_v51 = vmul.f32 %v5626_v46, %v5624_v61 }
 0x5fb   :  { %5025 = vmatpush3.bf16.msra.mxu1 %v5022_v43 }
 0x5fc   :  { %v5026_v48 = vpack.c.bf16 %v2934_v62, %v2933_v51 }
 0x5fe   :  { %5027 = vmatprep.subr.bf16.mxu1 %v5026_v48 }
 0x5ff   :  { %5029 = vmatpush3.bf16.msra.mxu1 %v5026_v48 }
 0x602   :  { %4871 = vmatmul.mubr.msk.f32.vlgmr.msra.gmra.mrb[32].mxu1 %vm1537_vm1, %v6670_v26 }
 0x603   :  { %4873 = vmatprep.mubr.msk.f32.mxu1 %vm1537_vm1, %v6677_v27 }
 0x606   :  { %4874 = vmatmul.mubr.msk.f32.gmra.mrb[34].mxu1 %vm1537_vm1, %v6684_v60 }
 0x607   :  { %4876 = vmatprep.mubr.msk.f32.mxu1 %vm1537_vm1, %v6691_v28 }
 0x60a   :  { %4877 = vmatmul.mubr.msk.f32.gmra.mrb[36].mxu1 %vm1537_vm1, %v6698_v30 }
 0x60b   :  { %4879 = vmatprep.mubr.msk.f32.mxu1 %vm1537_vm1, %v6705_v17 }
 0x60e   :  { %4880 = vmatmul.mubr.msk.f32.gmra.mrb[38].mxu1 %vm1537_vm1, %v6712_v18 }
 0x60f   :  { %4882 = vmatprep.mubr.msk.f32.mxu1 %vm1537_vm1, %v6719_v23 }
 0x612   :  { %4883 = vmatmul.mubr.msk.f32.gmra.mrb[40].mxu1 %vm1537_vm1, %v6726_v24 }
 0x613   :  { %4885 = vmatprep.mubr.msk.f32.mxu1 %vm1537_vm1, %v6733_v31 }
 0x616   :  { %4886 = vmatmul.mubr.msk.f32.gmra.mrb[42].mxu1 %vm1537_vm1, %v6740_v32 }
 0x617   :  { %4888 = vmatprep.mubr.msk.f32.mxu1 %vm1537_vm1, %v6747_v39 }
 0x61a   :  { %4889 = vmatmul.mubr.msk.f32.gmra.mrb[44].mxu1 %vm1537_vm1, %v6754_v33 }
 0x61b   :  { %4891 = vmatprep.mubr.msk.f32.mxu1 %vm1537_vm1, %v6761_v49 }
 0x61e   :  { %4892 = vmatmul.mubr.msk.f32.gmra.mrb[46].mxu1 %vm1537_vm1, %v6768_v25 }
 0x61f   :  { %4934 = vmatprep.mubr.msk.f32.mxu1 %vm1537_vm1, %v6775_v38 }
 0x6d5   :  { %v4872_v54 = vpop.f32.mrb[32].mxu1 }
 0x6d6   :  { %v5126_v21 = vadd.f32 %v4872_v54, %v6485_v14  ;;  %v3017_v56 = vpop.f32.mrb[33].mxu1 }
 0x6d7   :  { %v5127_v35 = vadd.f32 %v3017_v56, %v6481_v6 }
 0x6d8   :  { %v4116_v58 = vmul.f32 -1.442695, %v5126_v21 }
 0x6d9   :  { %v4115_v36 = vmul.f32 -1.442695, %v5127_v35  ;;  %v4875_v63 = vpop.f32.mrb[34].mxu1 }
 0x6da   :  { %5627 = vpow2.f32 %v4116_v58  ;;  %v5128_v1 = vadd.f32 %v4875_v63, %v6487_v15  ;;  %v3027_v2 = vpop.f32.mrb[35].mxu1 }
 0x6db   :  { %5629 = vpow2.f32 %v4115_v36  ;;  %v5129_v4 = vadd.f32 %v3027_v2, %v6489_v16 }
 0x6dc   :  { %v4118_v9 = vmul.f32 -1.442695, %v5128_v1 }
 0x6dd   :  { %v4878_v41 = vpop.f32.mrb[36].mxu1  ;;  %v4117_v10 = vmul.f32 -1.442695, %v5129_v4 }
 0x6de   :  { %5631 = vpow2.f32 %v4118_v9  ;;  %v5130_v38 = vadd.f32 %v4878_v41, %v6483_v12  ;;  %v3037_v0 = vpop.f32.mrb[37].mxu1 }
 0x6df   :  { %v5131_v3 = vadd.f32 %v3037_v0, %v6479_v5 }
 0x6e0   :  { %v4120_v42 = vmul.f32 -1.442695, %v5130_v38 }
 0x6e1   :  { %v4119_v11 = vmul.f32 -1.442695, %v5131_v3  ;;  %v4881_v13 = vpop.f32.mrb[38].mxu1 }
 0x6e2   :  { %5633 = vpow2.f32 %v4120_v42  ;;  %v5132_v55 = vadd.f32 %v4881_v13, %v6492_v20  ;;  %v3047_v45 = vpop.f32.mrb[39].mxu1 }
 0x6e3   :  { %5635 = vpow2.f32 %v4119_v11  ;;  %v5133_v40 = vadd.f32 %v3047_v45, %v6495_v22 }
 0x6e4   :  { %v5628_v57 = vpop.eup %5627  ;;  %v4122_v61 = vmul.f32 -1.442695, %v5132_v55  ;;  %5637 = vpow2.f32 %v4117_v10 }
 0x6e5   :  { %v5630_v43 = vpop.eup %5629  ;;  %v3149_v62 = vadd.f32 1.0, %v5628_v57  ;;  %v4121_v46 = vmul.f32 -1.442695, %v5133_v40  ;;  %v4884_v51 = vpop.f32.mrb[40].mxu1 }
 0x6e6   :  { %v3148_v48 = vadd.f32 1.0, %v5630_v43  ;;  %5639 = vpow2.f32 %v4122_v61  ;;  %v5134_v54 = vadd.f32 %v4884_v51, %v6498_v34  ;;  %v3057_v21 = vpop.f32.mrb[41].mxu1 }
 0x6e7   :  { %v5135_v56 = vadd.f32 %v3057_v21, %v6501_v37  ;;  %5641 = vrcp.f32 %v3149_v62 }
 0x6e8   :  { %v5632_v35 = vpop.eup %5631  ;;  %v4124_v58 = vmul.f32 -1.442695, %v5134_v54  ;;  %5643 = vpow2.f32 %v4121_v46 }
 0x6e9   :  { %v3151_v36 = vadd.f32 1.0, %v5632_v35  ;;  %v4123_v63 = vmul.f32 -1.442695, %v5135_v56  ;;  %v4887_v1 = vpop.f32.mrb[42].mxu1  ;;  %5645 = vrcp.f32 %v3148_v48 }
 0x6ea   :  { %v5136_v2 = vadd.f32 %v4887_v1, %v6513_v29  ;;  %v3067_v9 = vpop.f32.mrb[43].mxu1  ;;  %5647 = vpow2.f32 %v4124_v58 }
 0x6eb   :  { %v5137_v4 = vadd.f32 %v3067_v9, %v6515_v19  ;;  %5649 = vrcp.f32 %v3151_v36 }
 0x6ec   :  { %v5634_v41 = vpop.eup %5633  ;;  %v4126_v38 = vmul.f32 -1.442695, %v5136_v2  ;;  %5651 = vpow2.f32 %v4123_v63 }
 0x6ed   :  { %v5636_v0 = vpop.eup %5635  ;;  %v3153_v3 = vadd.f32 1.0, %v5634_v41  ;;  %v4125_v42 = vmul.f32 -1.442695, %v5137_v4  ;;  %v4890_v10 = vpop.f32.mrb[44].mxu1 }
 0x6ee   :  { %v3152_v11 = vadd.f32 1.0, %v5636_v0  ;;  %5653 = vpow2.f32 %v4126_v38  ;;  %v5138_v13 = vadd.f32 %v4890_v10, %v6506_v47  ;;  %v3077_v55 = vpop.f32.mrb[45].mxu1  ;;  %v5638_v45 = vpop.eup %5637 }
 0x6ef   :  { %5655 = vrcp.f32 %v3153_v3  ;;  %v5139_v57 = vadd.f32 %v3077_v55, %v6509_v50  ;;  %v3150_v54 = vadd.f32 1.0, %v5638_v45 }
 0x6f0   :  { %v5640_v40 = vpop.eup %5639  ;;  %5657 = vrcp.f32 %v3152_v11 }
 0x6f1   :  { %v3155_v61 = vadd.f32 1.0, %v5640_v40  ;;  %5659 = vpow2.f32 %v4125_v42  ;;  %v4893_v43 = vpop.f32.mrb[46].mxu1  ;;  %v5642_v62 = vpop.eup %5641 }
 0x6f2   :  { %5661 = vtanh.f32 %v5138_v13  ;;  %v5140_v46 = vadd.f32 %v4893_v43, %v6521_v44  ;;  %v3087_v51 = vpop.f32.mrb[47].mxu1  ;;  %v5644_v48 = vpop.eup %5643 }
 0x6f3   :  { %5663 = vrcp.f32 %v3155_v61  ;;  %v5646_v21 = vpop.eup %5645  ;;  %v3154_v56 = vadd.f32 1.0, %v5644_v48  ;;  %v5141_v35 = vadd.f32 %v3087_v51, %v6524_v53 }
 0x6f4   :  { %5665 = vtanh.f32 %v5139_v57  ;;  %v5648_v58 = vpop.eup %5647 }
 0x6f5   :  { %5667 = vtanh.f32 %v5140_v46  ;;  %v5650_v36 = vpop.eup %5649  ;;  %v3157_v0 = vadd.f32 1.0, %v5648_v58 }
 0x6f6   :  { %5669 = vrcp.f32 %v3154_v56  ;;  %v5652_v63 = vpop.eup %5651 }
 0x6f7   :  { %5671 = vrcp.f32 %v3150_v54  ;;  %v3156_v55 = vadd.f32 1.0, %v5652_v63 }
 0x6f8   :  { %v5654_v1 = vpop.eup %5653  ;;  %5673 = vtanh.f32 %v5141_v35 }
 0x6f9   :  { %v5656_v2 = vpop.eup %5655  ;;  %5675 = vrcp.f32 %v3157_v0  ;;  %v3159_v51 = vadd.f32 1.0, %v5654_v1 }
 0x6fa   :  { %v5658_v9 = vpop.eup %5657  ;;  %v3189_v41 = vmul.f32 %v5656_v2, %v6862_v59 }
 0x6fb   :  { %v5660_v4 = vpop.eup %5659  ;;  %v3188_v42 = vmul.f32 %v5658_v9, %v6866_v7 }
 0x6fc   :  { %v5662_v38 = vpop.eup %5661 }
 0x6fd   :  { %v5664_v3 = vpop.eup %5663  ;;  %v3193_v10 = vmul.f32 %v5662_v38, %v5642_v62  ;;  %v3158_v62 = vadd.f32 1.0, %v5660_v4 }
 0x6fe   :  { %v5666_v11 = vpop.eup %5665  ;;  %v3191_v13 = vmul.f32 %v5664_v3, %v6868_v52 }
 0x6ff   :  { %v5668_v45 = vpop.eup %5667  ;;  %v6926_v40 = vadd.f32 %v3193_v10, %v3189_v41  ;;  %v3192_v57 = vmul.f32 %v5666_v11, %v5646_v21 }
 0x700   :  { %v5670_v61 = vpop.eup %5669  ;;  %v3195_v43 = vmul.f32 %v5668_v45, %v5650_v36 }
 0x701   :  { %v5672_v46 = vpop.eup %5671  ;;  %v3190_v59 = vmul.f32 %v5670_v61, %v6872_v8  ;;  %5677 = vtanh.f32 %v6926_v40  ;;  %v6930_v48 = vadd.f32 %v3192_v57, %v3188_v42 }
 0x702   :  { %v5674_v7 = vpop.eup %5673  ;;  %5679 = vrcp.f32 %v3156_v55  ;;  %v6932_v52 = vadd.f32 %v3195_v43, %v3191_v13 }
 0x703   :  { %5681 = vtanh.f32 %v6930_v48  ;;  %v3194_v54 = vmul.f32 %v5674_v7, %v5672_v46  ;;  %v5676_v8 = vpop.eup %5675 }
 0x704   :  { %5683 = vtanh.f32 %v6932_v52 }
 0x705   :  { %5685 = vrcp.f32 %v3159_v51  ;;  %v6936_v21 = vadd.f32 %v3194_v54, %v3190_v59 }
 0x706   :  { %5687 = vrcp.f32 %v3158_v62 }
 0x707   :  { %5689 = vtanh.f32 %v6936_v21 }
 0x70b   :  { %v5678_v56 = vpop.eup %5677 }
 0x70c   :  { %v5680_v35 = vpop.eup %5679  ;;  %v3205_v58 = vmul.f32 %v5678_v56, %v5676_v8 }
 0x70d   :  { %v5682_v36 = vpop.eup %5681 }
 0x70e   :  { %v5684_v63 = vpop.eup %5683  ;;  %v3204_v1 = vmul.f32 %v5682_v36, %v5680_v35 }
 0x70f   :  { %v5686_v2 = vpop.eup %5685 }
 0x710   :  { %v5688_v9 = vpop.eup %5687  ;;  %v5030_v4 = vpack.c.bf16 %v3205_v58, %v3204_v1  ;;  %v3207_v41 = vmul.f32 %v5686_v2, %v5684_v63 }
 0x711   :  { %v5690_v38 = vpop.eup %5689 }
 0x712   :  { %5031 = vmatprep.subr.bf16.mxu0 %v5030_v4  ;;  %v3206_v0 = vmul.f32 %v5690_v38, %v5688_v9 }
 0x713   :  { %5033 = vmatpush3.bf16.msra.mxu0 %v5030_v4 }
 0x714   :  { %v5034_v3 = vpack.c.bf16 %v3207_v41, %v3206_v0 }
 0x716   :  { %5035 = vmatprep.subr.bf16.mxu0 %v5034_v3 }
 0x717   :  { %5037 = vmatpush3.bf16.msra.mxu0 %v5034_v3 }
 0x71a   :  { %4903 = vmatmul.mubr.msk.f32.vlgmr.msra.gmra.mrb[48].mxu0 %vm1537_vm1, %v6670_v26 }
 0x71b   :  { %4905 = vmatprep.mubr.msk.f32.mxu0 %vm1537_vm1, %v6677_v27 }
 0x71e   :  { %4906 = vmatmul.mubr.msk.f32.gmra.mrb[50].mxu0 %vm1537_vm1, %v6684_v60 }
 0x71f   :  { %4908 = vmatprep.mubr.msk.f32.mxu0 %vm1537_vm1, %v6691_v28 }
 0x722   :  { %4909 = vmatmul.mubr.msk.f32.gmra.mrb[52].mxu0 %vm1537_vm1, %v6698_v30 }
 0x723   :  { %4911 = vmatprep.mubr.msk.f32.mxu0 %vm1537_vm1, %v6705_v17 }
 0x726   :  { %4912 = vmatmul.mubr.msk.f32.gmra.mrb[54].mxu0 %vm1537_vm1, %v6712_v18 }
 0x727   :  { %4914 = vmatprep.mubr.msk.f32.mxu0 %vm1537_vm1, %v6719_v23 }
 0x72a   :  { %4915 = vmatmul.mubr.msk.f32.gmra.mrb[56].mxu0 %vm1537_vm1, %v6726_v24 }
 0x72b   :  { %4917 = vmatprep.mubr.msk.f32.mxu0 %vm1537_vm1, %v6733_v31 }
 0x72e   :  { %4918 = vmatmul.mubr.msk.f32.gmra.mrb[58].mxu0 %vm1537_vm1, %v6740_v32 }
 0x72f   :  { %4920 = vmatprep.mubr.msk.f32.mxu0 %vm1537_vm1, %v6747_v39 }
 0x732   :  { %4921 = vmatmul.mubr.msk.f32.gmra.mrb[60].mxu0 %vm1537_vm1, %v6754_v33 }
 0x733   :  { %4923 = vmatprep.mubr.msk.f32.mxu0 %vm1537_vm1, %v6761_v49 }
 0x736   :  { %4924 = vmatmul.mubr.msk.f32.gmra.mrb[62].mxu0 %vm1537_vm1, %v6768_v25 }
 0x7ed   :  { %v4904_v26 = vpop.f32.mrb[48].mxu0 }
 0x7ee   :  { %v5142_v27 = vadd.f32 %v4904_v26, %v6485_v14  ;;  %v3290_v60 = vpop.f32.mrb[49].mxu0 }
 0x7ef   :  { %v5143_v28 = vadd.f32 %v3290_v60, %v6481_v6 }
 0x7f0   :  { %v4144_v30 = vmul.f32 -1.442695, %v5142_v27 }
 0x7f1   :  { %v4143_v17 = vmul.f32 -1.442695, %v5143_v28  ;;  %v4907_v18 = vpop.f32.mrb[50].mxu0 }
 0x7f2   :  { %5691 = vpow2.f32 %v4144_v30  ;;  %v5144_v23 = vadd.f32 %v4907_v18, %v6487_v15  ;;  %v3300_v24 = vpop.f32.mrb[51].mxu0 }
 0x7f3   :  { %5693 = vpow2.f32 %v4143_v17  ;;  %v5145_v32 = vadd.f32 %v3300_v24, %v6489_v16 }
 0x7f4   :  { %v4146_v31 = vmul.f32 -1.442695, %v5144_v23 }
 0x7f5   :  { %v4910_v39 = vpop.f32.mrb[52].mxu0  ;;  %v4145_v10 = vmul.f32 -1.442695, %v5145_v32 }
 0x7f6   :  { %5695 = vpow2.f32 %v4146_v31  ;;  %v5146_v33 = vadd.f32 %v4910_v39, %v6483_v12  ;;  %v3310_v49 = vpop.f32.mrb[53].mxu0 }
 0x7f7   :  { %v5147_v25 = vadd.f32 %v3310_v49, %v6479_v5 }
 0x7f8   :  { %v4148_v42 = vmul.f32 -1.442695, %v5146_v33 }
 0x7f9   :  { %v4147_v11 = vmul.f32 -1.442695, %v5147_v25  ;;  %v4913_v13 = vpop.f32.mrb[54].mxu0 }
 0x7fa   :  { %5697 = vpow2.f32 %v4148_v42  ;;  %v5148_v55 = vadd.f32 %v4913_v13, %v6492_v20  ;;  %v3320_v45 = vpop.f32.mrb[55].mxu0 }
 0x7fb   :  { %5699 = vpow2.f32 %v4147_v11  ;;  %v5149_v57 = vadd.f32 %v3320_v45, %v6495_v22 }
 0x7fc   :  { %v5692_v61 = vpop.eup %5691  ;;  %v4150_v43 = vmul.f32 -1.442695, %v5148_v55  ;;  %5701 = vpow2.f32 %v4145_v10 }
 0x7fd   :  { %v5694_v46 = vpop.eup %5693  ;;  %v3422_v59 = vadd.f32 1.0, %v5692_v61  ;;  %v4149_v51 = vmul.f32 -1.442695, %v5149_v57  ;;  %v4916_v7 = vpop.f32.mrb[56].mxu0 }
 0x7fe   :  { %v3421_v62 = vadd.f32 1.0, %v5694_v46  ;;  %5703 = vpow2.f32 %v4150_v43  ;;  %v5150_v54 = vadd.f32 %v4916_v7, %v6498_v34  ;;  %v3330_v8 = vpop.f32.mrb[57].mxu0 }
 0x7ff   :  { %v5151_v56 = vadd.f32 %v3330_v8, %v6501_v37  ;;  %5705 = vrcp.f32 %v3422_v59 }
 0x800   :  { %v5696_v35 = vpop.eup %5695  ;;  %v4152_v58 = vmul.f32 -1.442695, %v5150_v54  ;;  %5707 = vpow2.f32 %v4149_v51 }
 0x801   :  { %v3424_v36 = vadd.f32 1.0, %v5696_v35  ;;  %v4151_v63 = vmul.f32 -1.442695, %v5151_v56  ;;  %v4919_v1 = vpop.f32.mrb[58].mxu0  ;;  %5709 = vrcp.f32 %v3421_v62 }
 0x802   :  { %v5152_v2 = vadd.f32 %v4919_v1, %v6513_v29  ;;  %v3340_v9 = vpop.f32.mrb[59].mxu0  ;;  %5711 = vpow2.f32 %v4152_v58 }
 0x803   :  { %v5153_v4 = vadd.f32 %v3340_v9, %v6515_v19  ;;  %5713 = vrcp.f32 %v3424_v36 }
 0x804   :  { %v5698_v41 = vpop.eup %5697  ;;  %v4154_v38 = vmul.f32 -1.442695, %v5152_v2  ;;  %5715 = vpow2.f32 %v4151_v63 }
 0x805   :  { %v5700_v0 = vpop.eup %5699  ;;  %v3426_v3 = vadd.f32 1.0, %v5698_v41  ;;  %v4153_v26 = vmul.f32 -1.442695, %v5153_v4  ;;  %v4922_v27 = vpop.f32.mrb[60].mxu0 }
 0x806   :  { %v3425_v60 = vadd.f32 1.0, %v5700_v0  ;;  %5717 = vpow2.f32 %v4154_v38  ;;  %v5154_v28 = vadd.f32 %v4922_v27, %v6506_v47  ;;  %v3350_v30 = vpop.f32.mrb[61].mxu0  ;;  %v5702_v17 = vpop.eup %5701 }
 0x807   :  { %5719 = vrcp.f32 %v3426_v3  ;;  %v5155_v23 = vadd.f32 %v3350_v30, %v6509_v50  ;;  %v3423_v25 = vadd.f32 1.0, %v5702_v17 }
 0x808   :  { %v5704_v18 = vpop.eup %5703  ;;  %5721 = vrcp.f32 %v3425_v60 }
 0x809   :  { %v3428_v24 = vadd.f32 1.0, %v5704_v18  ;;  %5723 = vpow2.f32 %v4153_v26  ;;  %v4925_v31 = vpop.f32.mrb[62].mxu0  ;;  %v5706_v32 = vpop.eup %5705 }
 0x80a   :  { %5725 = vtanh.f32 %v5154_v28  ;;  %v5156_v39 = vadd.f32 %v4925_v31, %v6521_v44  ;;  %v3360_v33 = vpop.f32.mrb[63].mxu0  ;;  %v5708_v49 = vpop.eup %5707 }
 0x80b   :  { %5727 = vrcp.f32 %v3428_v24  ;;  %v5710_v42 = vpop.eup %5709  ;;  %v3427_v10 = vadd.f32 1.0, %v5708_v49  ;;  %v5157_v11 = vadd.f32 %v3360_v33, %v6524_v53 }
 0x80c   :  { %5729 = vtanh.f32 %v5155_v23  ;;  %v5712_v13 = vpop.eup %5711 }
 0x80d   :  { %5731 = vtanh.f32 %v5156_v39  ;;  %v5714_v55 = vpop.eup %5713  ;;  %v3430_v7 = vadd.f32 1.0, %v5712_v13  ;;  %v5839_v13 = vld [vmem:[%s7095_s2 + $0x28] sm:$0xff] }
 0x80e   :  { %5733 = vrcp.f32 %v3427_v10  ;;  %v5716_v45 = vpop.eup %5715  ;;  %v5837_v10 = vld [vmem:[%s7095_s2 + $0x18] sm:$0xff] }
 0x80f   :  { %5735 = vrcp.f32 %v3423_v25  ;;  %v3429_v58 = vadd.f32 1.0, %v5716_v45  ;;  %v5835_v25 = vld [vmem:[%s7095_s2 + $0x8] sm:$0xff]  ;;  %v5841_v45 = vld [vmem:[%s7095_s2 + $0x38] sm:$0xff] }
 0x810   :  { %v5718_v57 = vpop.eup %5717  ;;  %5737 = vtanh.f32 %v5157_v11  ;;  %v5838_v11 = vld [vmem:[%s7095_s2 + $0x20] sm:$0xff] }
 0x811   :  { %v5720_v61 = vpop.eup %5719  ;;  %5739 = vrcp.f32 %v3430_v7  ;;  %v3432_v41 = vadd.f32 1.0, %v5718_v57  ;;  %v5842_v57 = vld [vmem:[%s7095_s2 + $0x40] sm:$0xff]  ;;  %v5848_v7 = vld [vmem:[%s7095_s2 + $0x70] sm:$0xff] }
 0x812   :  { %v5722_v43 = vpop.eup %5721  ;;  %v3462_v59 = vmul.f32 %v5720_v61, %v6926_v40  ;;  %v5843_v61 = vld [vmem:[%s7095_s2 + $0x48] sm:$0xff] }
 0x813   :  { %v5724_v46 = vpop.eup %5723  ;;  %v3461_v54 = vmul.f32 %v5722_v43, %v6930_v48  ;;  %v5844_v43 = vld [vmem:[%s7095_s2 + $0x50] sm:$0xff] }
 0x814   :  { %v5726_v51 = vpop.eup %5725  ;;  %v3431_v0 = vadd.f32 1.0, %v5724_v46  ;;  %v5845_v46 = vld [vmem:[%s7095_s2 + $0x58] sm:$0xff] }
 0x815   :  { %v5728_v62 = vpop.eup %5727  ;;  %v3466_v8 = vmul.f32 %v5726_v51, %v5706_v32  ;;  %v5847_v51 = vld [vmem:[%s7095_s2 + $0x68] sm:$0xff] }
 0x816   :  { %v5730_v56 = vpop.eup %5729  ;;  %v3464_v35 = vmul.f32 %v5728_v62, %v6932_v52  ;;  %v5849_v62 = vld [vmem:[%s7095_s2 + $0x78] sm:$0xff] }
 0x817   :  { %v5732_v36 = vpop.eup %5731  ;;  %v6988_v63 = vadd.f32 %v3466_v8, %v3462_v59  ;;  %v3465_v1 = vmul.f32 %v5730_v56, %v5710_v42  ;;  %v5836_v42 = vld [vmem:[%s7095_s2 + $0x10] sm:$0xff]  ;;  %v5846_v59 = vld [vmem:[%s7095_s2 + $0x60] sm:$0xff] }
 0x818   :  { %v5734_v2 = vpop.eup %5733  ;;  %v3468_v9 = vmul.f32 %v5732_v36, %v5714_v55  ;;  %v5840_v55 = vld [vmem:[%s7095_s2 + $0x30] sm:$0xff]  ;;  %s5876_s2 = smov [#allocation4]  }
 0x819   :  { %v5736_v4 = vpop.eup %5735  ;;  %v3463_v40 = vmul.f32 %v5734_v2, %v6936_v21  ;;  %5741 = vtanh.f32 %v6988_v63  ;;  %v6992_v38 = vadd.f32 %v3465_v1, %v3461_v54  ;;  %s3809_s5 = sshll.u32 %s5876_s2, 4  ;;  %s3810_s5 = int_to_ptr.vmem [resolvable:$true] %s3809_s5 }
 0x81a   :  { %v5738_v48 = vpop.eup %5737  ;;  %5743 = vrcp.f32 %v3429_v58  ;;  %v6994_v52 = vadd.f32 %v3468_v9, %v3464_v35  ;;  %s5850_s29 = scalar_lea.vmem %s3810_s5, 16  ;;  %s5854_s30 = scalar_lea.vmem %s3810_s5, 32 }
 0x81b   :  { %5745 = vtanh.f32 %v6992_v38  ;;  %v3467_v3 = vmul.f32 %v5738_v48, %v5736_v4  ;;  %v5740_v21 = vpop.eup %5739  ;;  %p5851_p0 = scmp.ne.s32.totalorder %s3810_s5, %s5850_s29  ;;  %p5855_p1 = scmp.lt.s32.totalorder %s3810_s5, %s3810_s5 }
 0x81c   :  { %5747 = vtanh.f32 %v6994_v52  ;;  %p5856_p2 = scmp.lt.s32.totalorder %s5854_s30, %s5850_s29 }
 0x81d   :  { %5749 = vrcp.f32 %v3432_v41  ;;  %v6998_v26 = vadd.f32 %v3467_v3, %v3463_v40 }
 0x81e   :  { %5751 = vrcp.f32 %v3431_v0  ;;  %p5857_p3 = por %p5856_p2, %p5855_p1 }
 0x81f   :  { %5753 = vtanh.f32 %v6998_v26 }
 0x820   :  { %p5858_p4 = pnand %p5857_p3, %p5851_p0 }
 0x823   :  { %v5742_v27 = vpop.eup %5741 }
 0x824   :  { %v5744_v60 = vpop.eup %5743  ;;  %v3478_v28 = vmul.f32 %v5742_v27, %v5740_v21 }
 0x825   :  { %v5746_v30 = vpop.eup %5745 }
 0x826   :  { %v5748_v17 = vpop.eup %5747  ;;  %v3477_v18 = vmul.f32 %v5746_v30, %v5744_v60 }
 0x827   :  { %v5750_v23 = vpop.eup %5749 }
 0x828   :  { %v5752_v24 = vpop.eup %5751  ;;  %v5038_v31 = vpack.c.bf16 %v3478_v28, %v3477_v18  ;;  %v3480_v32 = vmul.f32 %v5750_v23, %v5748_v17 }
 0x829   :  { %v5754_v39 = vpop.eup %5753 }
 0x82a   :  { %5039 = vmatprep.subr.bf16.mxu1 %v5038_v31  ;;  %v3479_v33 = vmul.f32 %v5754_v39, %v5752_v24 }
 0x82b   :  { %5041 = vmatpush3.bf16.msra.mxu1 %v5038_v31 }
 0x82c   :  { %v5042_v49 = vpack.c.bf16 %v3480_v32, %v3479_v33 }
 0x82e   :  { %5043 = vmatprep.subr.bf16.mxu1 %v5042_v49 }
 0x82f   :  { %5045 = vmatpush3.bf16.msra.mxu1 %v5042_v49 }
 0x832   :  { %4935 = vmatmul.mubr.msk.f32.vlgmr.msra.gmra.mrb[48].mxu1 %vm1537_vm1, %v5835_v25 }
 0x833   :  { %4937 = vmatprep.mubr.msk.f32.mxu1 %vm1537_vm1, %v5836_v42 }
 0x836   :  { %4938 = vmatmul.mubr.msk.f32.gmra.mrb[50].mxu1 %vm1537_vm1, %v5837_v10 }
 0x837   :  { %4940 = vmatprep.mubr.msk.f32.mxu1 %vm1537_vm1, %v5838_v11 }
 0x83a   :  { %4941 = vmatmul.mubr.msk.f32.gmra.mrb[52].mxu1 %vm1537_vm1, %v5839_v13 }
 0x83b   :  { %4943 = vmatprep.mubr.msk.f32.mxu1 %vm1537_vm1, %v5840_v55 }
 0x83e   :  { %4944 = vmatmul.mubr.msk.f32.gmra.mrb[54].mxu1 %vm1537_vm1, %v5841_v45 }
 0x83f   :  { %4946 = vmatprep.mubr.msk.f32.mxu1 %vm1537_vm1, %v5842_v57 }
 0x842   :  { %4947 = vmatmul.mubr.msk.f32.gmra.mrb[56].mxu1 %vm1537_vm1, %v5843_v61 }
 0x843   :  { %4949 = vmatprep.mubr.msk.f32.mxu1 %vm1537_vm1, %v5844_v43 }
 0x846   :  { %4950 = vmatmul.mubr.msk.f32.gmra.mrb[58].mxu1 %vm1537_vm1, %v5845_v46 }
 0x847   :  { %4952 = vmatprep.mubr.msk.f32.mxu1 %vm1537_vm1, %v5846_v59 }
 0x84a   :  { %4953 = vmatmul.mubr.msk.f32.gmra.mrb[60].mxu1 %vm1537_vm1, %v5847_v51 }
 0x84b   :  { %4955 = vmatprep.mubr.msk.f32.mxu1 %vm1537_vm1, %v5848_v7 }
 0x84e   :  { %4956 = vmatmul.mubr.msk.f32.gmra.mrb[62].mxu1 %vm1537_vm1, %v5849_v62 }
 0x905   :  { %v4936_v54 = vpop.f32.mrb[48].mxu1 }
 0x906   :  { %v5158_v8 = vadd.f32 %v4936_v54, %v6485_v14  ;;  %v3563_v56 = vpop.f32.mrb[49].mxu1 }
 0x907   :  { %v5159_v35 = vadd.f32 %v3563_v56, %v6481_v6 }
 0x908   :  { %v4172_v58 = vmul.f32 -1.442695, %v5158_v8 }
 0x909   :  { %v4171_v36 = vmul.f32 -1.442695, %v5159_v35  ;;  %v4939_v1 = vpop.f32.mrb[50].mxu1 }
 0x90a   :  { %5755 = vpow2.f32 %v4172_v58  ;;  %v5160_v2 = vadd.f32 %v4939_v1, %v6487_v15  ;;  %v3573_v9 = vpop.f32.mrb[51].mxu1 }
 0x90b   :  { %5757 = vpow2.f32 %v4171_v36  ;;  %v5161_v40 = vadd.f32 %v3573_v9, %v6489_v16 }
 0x90c   :  { %v4174_v4 = vmul.f32 -1.442695, %v5160_v2 }
 0x90d   :  { %v4942_v41 = vpop.f32.mrb[52].mxu1  ;;  %v4173_v6 = vmul.f32 -1.442695, %v5161_v40 }
 0x90e   :  { %5759 = vpow2.f32 %v4174_v4  ;;  %v5162_v48 = vadd.f32 %v4942_v41, %v6483_v12  ;;  %v3583_v0 = vpop.f32.mrb[53].mxu1 }
 0x90f   :  { %v5163_v14 = vadd.f32 %v3583_v0, %v6479_v5 }
 0x910   :  { %v4176_v3 = vmul.f32 -1.442695, %v5162_v48 }
 0x911   :  { %v4175_v21 = vmul.f32 -1.442695, %v5163_v14  ;;  %v4945_v27 = vpop.f32.mrb[54].mxu1 }
 0x912   :  { %5761 = vpow2.f32 %v4176_v3  ;;  %v5164_v60 = vadd.f32 %v4945_v27, %v6492_v20  ;;  %v3593_v15 = vpop.f32.mrb[55].mxu1 }
 0x913   :  { %5763 = vpow2.f32 %v4175_v21  ;;  %v5165_v28 = vadd.f32 %v3593_v15, %v6495_v22 }
 0x914   :  { %v5756_v30 = vpop.eup %5755  ;;  %v4178_v16 = vmul.f32 -1.442695, %v5164_v60  ;;  %5765 = vpow2.f32 %v4173_v6 }
 0x915   :  { %v5758_v17 = vpop.eup %5757  ;;  %v3695_v18 = vadd.f32 1.0, %v5756_v30  ;;  %v4177_v12 = vmul.f32 -1.442695, %v5165_v28  ;;  %v4948_v23 = vpop.f32.mrb[56].mxu1 }
 0x916   :  { %v3694_v24 = vadd.f32 1.0, %v5758_v17  ;;  %5767 = vpow2.f32 %v4178_v16  ;;  %v5166_v5 = vadd.f32 %v4948_v23, %v6498_v34  ;;  %v3603_v31 = vpop.f32.mrb[57].mxu1 }
 0x917   :  { %v5167_v32 = vadd.f32 %v3603_v31, %v6501_v37  ;;  %5769 = vrcp.f32 %v3695_v18 }
 0x918   :  { %v5760_v39 = vpop.eup %5759  ;;  %v4180_v20 = vmul.f32 -1.442695, %v5166_v5  ;;  %5771 = vpow2.f32 %v4177_v12 }
 0x919   :  { %v3697_v33 = vadd.f32 1.0, %v5760_v39  ;;  %v4179_v22 = vmul.f32 -1.442695, %v5167_v32  ;;  %v4951_v49 = vpop.f32.mrb[58].mxu1  ;;  %5773 = vrcp.f32 %v3694_v24 }
 0x91a   :  { %v5168_v25 = vadd.f32 %v4951_v49, %v6513_v29  ;;  %v3613_v42 = vpop.f32.mrb[59].mxu1  ;;  %5775 = vpow2.f32 %v4180_v20 }
 0x91b   :  { %v5169_v10 = vadd.f32 %v3613_v42, %v6515_v19  ;;  %5777 = vrcp.f32 %v3697_v33 }
 0x91c   :  { %v5762_v11 = vpop.eup %5761  ;;  %v4182_v34 = vmul.f32 -1.442695, %v5168_v25  ;;  %5779 = vpow2.f32 %v4179_v22  ;;  %v3761_v22 = vpop.permute.xlu0 %3760 }
 0x91d   :  { %v5764_v13 = vpop.eup %5763  ;;  %v3699_v55 = vadd.f32 1.0, %v5762_v11  ;;  %v4181_v37 = vmul.f32 -1.442695, %v5169_v10  ;;  %v4954_v45 = vpop.f32.mrb[60].mxu1 }
 0x91e   :  { %v3698_v57 = vadd.f32 1.0, %v5764_v13  ;;  %5781 = vpow2.f32 %v4182_v34  ;;  %v5170_v61 = vadd.f32 %v4954_v45, %v6506_v47  ;;  %v3623_v43 = vpop.f32.mrb[61].mxu1  ;;  %v5766_v46 = vpop.eup %5765 }
 0x91f   :  { %5783 = vrcp.f32 %v3699_v55  ;;  %v5171_v59 = vadd.f32 %v3623_v43, %v6509_v50  ;;  %v3696_v56 = vadd.f32 1.0, %v5766_v46 }
 0x920   :  { %v5768_v29 = vpop.eup %5767  ;;  %5785 = vrcp.f32 %v3698_v57  ;;  %v3771_v45 = vpop.permute.xlu0 %3770 }
 0x921   :  { %v3701_v19 = vadd.f32 1.0, %v5768_v29  ;;  %5787 = vpow2.f32 %v4181_v37  ;;  %v4957_v51 = vpop.f32.mrb[62].mxu1  ;;  %v5770_v7 = vpop.eup %5769  ;;  %v3797_v29 = vlaneseq }
 0x922   :  { %5789 = vtanh.f32 %v5170_v61  ;;  %v5172_v62 = vadd.f32 %v4957_v51, %v6521_v44  ;;  %v3633_v54 = vpop.f32.mrb[63].mxu1  ;;  %v5772_v8 = vpop.eup %5771 }
 0x923   :  { %5791 = vrcp.f32 %v3701_v19  ;;  %v5774_v35 = vpop.eup %5773  ;;  %v3700_v47 = vadd.f32 1.0, %v5772_v8  ;;  %v5173_v58 = vadd.f32 %v3633_v54, %v6524_v53  ;;  %v3798_v51 = vshrl.u32 %v3797_v29, 7 }
 0x924   :  { %5793 = vtanh.f32 %v5171_v59  ;;  %v5776_v36 = vpop.eup %5775 }
 0x925   :  { %5795 = vtanh.f32 %v5172_v62  ;;  %v5778_v1 = vpop.eup %5777  ;;  %v3703_v41 = vadd.f32 1.0, %v5776_v36  ;;  %v3799_v54 = vsub.s32 0, %v3798_v51 }
 0x926   :  { %5797 = vrcp.f32 %v3700_v47  ;;  %v5780_v50 = vpop.eup %5779 }
 0x927   :  { %5799 = vrcp.f32 %v3696_v56  ;;  %v3702_v0 = vadd.f32 1.0, %v5780_v50  ;;  %v3795_v56 = vpop.permute.xlu0 %3794 }
 0x928   :  { %v5782_v2 = vpop.eup %5781  ;;  %5801 = vtanh.f32 %v5173_v58  ;;  %v3800_v47 = vrot.slane %v3795_v56, %v3799_v54 }
 0x929   :  { %v5784_v9 = vpop.eup %5783  ;;  %v3705_v27 = vadd.f32 1.0, %v5782_v2  ;;  %5803 = vrcp.f32 %v3703_v41 }
 0x92a   :  { %v5786_v4 = vpop.eup %5785  ;;  %v3735_v40 = vmul.f32 %v5784_v9, %v6988_v63  ;;  %5805 = vrcp.f32 %v3702_v0 }
 0x92b   :  { %v5788_v44 = vpop.eup %5787  ;;  %v3734_v3 = vmul.f32 %v5786_v4, %v6992_v38 }
 0x92c   :  { %v5790_v48 = vpop.eup %5789  ;;  %v3704_v38 = vadd.f32 1.0, %v5788_v44 }
 0x92d   :  { %v5792_v14 = vpop.eup %5791  ;;  %v3739_v53 = vmul.f32 %v5790_v48, %v5770_v7 }
 0x92e   :  { %v5794_v6 = vpop.eup %5793  ;;  %v3737_v21 = vmul.f32 %v5792_v14, %v6994_v52 }
 0x92f   :  { %v5796_v60 = vpop.eup %5795  ;;  %v3743_v15 = vadd.f32 %v3739_v53, %v3735_v40  ;;  %v3738_v28 = vmul.f32 %v5794_v6, %v5774_v35 }
 0x930   :  { %v5798_v30 = vpop.eup %5797  ;;  %v3741_v16 = vmul.f32 %v5796_v60, %v5778_v1 }
 0x931   :  { %v5800_v17 = vpop.eup %5799  ;;  %v3736_v63 = vmul.f32 %v5798_v30, %v6998_v26  ;;  %5807 = vtanh.f32 %v3743_v15  ;;  %v3742_v18 = vadd.f32 %v3738_v28, %v3734_v3  ;;  %v3766_v26 = vpop.permute.xlu1 %3765 }
 0x932   :  { %v5802_v12 = vpop.eup %5801  ;;  %5809 = vrcp.f32 %v3705_v27  ;;  %v3745_v23 = vadd.f32 %v3741_v16, %v3737_v21 }
 0x933   :  { %5811 = vtanh.f32 %v3742_v18  ;;  %v3740_v24 = vmul.f32 %v5802_v12, %v5800_v17  ;;  %v5804_v5 = vpop.eup %5803 }
 0x934   :  { %5813 = vtanh.f32 %v3745_v23  ;;  %v5806_v31 = vpop.eup %5805 }
 0x935   :  { %v3744_v52 = vadd.f32 %v3740_v24, %v3736_v63  ;;  %5815 = vrcp.f32 %v3704_v38  ;;  %v3776_v61 = vpop.permute.xlu1 %3775 }
 0x937   :  { %5817 = vtanh.f32 %v3744_v52 }
 0x93b   :  { %v5808_v32 = vpop.eup %5807 }
 0x93c   :  { %v5810_v39 = vpop.eup %5809  ;;  %v3751_v20 = vmul.f32 %v5808_v32, %v5804_v5 }
 0x93d   :  { %v5812_v33 = vpop.eup %5811 }
 0x93e   :  { %v5814_v49 = vpop.eup %5813  ;;  %v3750_v25 = vmul.f32 %v5812_v33, %v5806_v31  ;;  %v3779_v42 = vmul.f32 %v3766_v26, %v3751_v20 }
 0x93f   :  { %v3753_v10 = vmul.f32 %v5814_v49, %v5810_v39  ;;  %v5816_v11 = vpop.eup %5815 }
 0x940   :  { %v3778_v34 = vmul.f32 %v3761_v22, %v3750_v25 }
 0x941   :  { %v5818_v13 = vpop.eup %5817  ;;  %v3781_v43 = vmul.f32 %v3776_v61, %v3753_v10 }
 0x942   :  { %v3752_v55 = vmul.f32 %v5818_v13, %v5816_v11  ;;  %v3782_v37 = vadd.f32 %v3779_v42, %v3778_v34 }
 0x944   :  { %v3780_v57 = vmul.f32 %v3771_v45, %v3752_v55 }
 0x946   :  { %v3783_v46 = vadd.f32 %v3782_v37, %v3780_v57 }
 0x948   :  { %v3784_v59 = vadd.f32 %v3783_v46, %v3781_v43 }
 0x94a   :  { %v3785_v19 = vrot.slane %v3784_v59, 4 }
 0x94c   :  { %v3786_v7 = vadd.f32 %v3785_v19, %v3784_v59 }
 0x94e   :  { %v3787_v62 = vrot.slane %v3786_v7, 2 }
 0x950   :  { %v3788_v8 = vadd.f32 %v3787_v62, %v3786_v7 }
 0x952   :  { %v3789_v35 = vrot.slane %v3788_v8, 1 }
 0x954   :  { %v3790_v58 = vadd.f32 %v3789_v35, %v3788_v8 }
 0x956   :  { %v3801_v36 = vadd.f32 %v3800_v47, %v3790_v58 }
 0x958   :  { %3802 = vst [vmem:[#allocation4] sm:$0x1] %v3801_v36 }
 0x959   :  { %5861 = shalt.err (!%p5858_p4)
}
 0x95a   :  { %s5862_s9 = scalar_lea.hbm %s7099_s6, 16 }
 0x95b   :  { %p5863_p5 = scmp.ne.s32.totalorder %s7099_s6, %s5862_s9  ;;  %p5866_p6 = scmp.lt.u32.totalorder %s5862_s9, %s7099_s6 }
 0x95d   :  { %p5868_p7 = pnand %p5866_p6, %p5863_p5 }
 0x95f   :  { %5871 = shalt.err (!%p5868_p7)
}
 0x960   :  { %3812 = dma.vmem_to_hbm [thread:$0]  %s3810_s5, 16, %s7099_s6, [#allocation5]  }
 0x961   :  { %5872 = dma.done.wait [#allocation5], 16  }
 0x962   :  { %5873 = vsyncadd [#allocation5], 4294967280 }
 0x963   :  { %3816 = vsyncpa [#allocation5], 1 }

</bundles_post_ra>
